<compile_context>
chip_gen: v6e
topology: v6e:2x2x1
jax: 0.10.0
libtpu: 0.0.40
codegen_flags: <defaults>
</compile_context>

<pallas_src>
import math
import jax
import jax.numpy as jnp
from jax import lax
from jax.experimental import pallas as pl
from jax.experimental.pallas import tpu as pltpu

# ---- model hyper-parameters (small, consistent with the module) -------------
D_MODEL = 32
N_HEADS = 4
D_FF = 64
N_LAYERS = 2
EPS = 1e-6          # matches LayerNorm(features, eps=1e-06)
NEG_INF = -1e9      # matches masked_fill(mask == 0, -1e9)

VEC_W = 3 * D_MODEL          # widest packed vector param (b_qkv)
SLOT = 128                   # lane-aligned slot width inside the packed weight slab
ROWS_PER_LAYER = 8           # packed vector rows per layer


# ---- in-kernel helpers -------------------------------------------------------
def _layernorm(x, a, b):
    """Uni-RXN LayerNorm: a * (x - mean) / (std + eps) + b.

    torch .std() is unbiased (ddof=1) and eps is added to std (NOT var)."""
    d = x.shape[-1]
    mean = jnp.mean(x, axis=-1, keepdims=True)
    diff = x - mean
    var = jnp.sum(diff * diff, axis=-1, keepdims=True) * (1.0 / (d - 1))  # ddof=1
    std = jnp.sqrt(var)
    return a * (diff / (std + EPS)) + b


def _softmax_last(x):
    m = jnp.max(x, axis=-1, keepdims=True)
    e = jnp.exp(x - m)
    return e / jnp.sum(e, axis=-1, keepdims=True)


# ---- fused Pallas kernel (factory closes over static config) ----------------
def _make_kernel(n_layers, n_heads, mxu_bf16):
    def dot(a, b):
        if mxu_bf16:
            a = a.astype(jnp.bfloat16)
            b = b.astype(jnp.bfloat16)
        return jnp.dot(a, b, preferred_element_type=jnp.float32)

    def dot_nt(a, b):   # a @ b.T without an explicit transpose op
        if mxu_bf16:
            a = a.astype(jnp.bfloat16)
            b = b.astype(jnp.bfloat16)
        return lax.dot_general(a, b, (((1,), (1,)), ((), ())),
                               preferred_element_type=jnp.float32)

    def kernel(x_ref, mask_ref, vec_ref, wmain_ref, wff2_ref, o_ref, ctx_sc):
        x = x_ref[0]                       # (R, D) f32 — fused batch slab
        R, D = x.shape
        F = wff2_ref.shape[1]
        dk = D // n_heads
        scale = 1.0 / math.sqrt(dk)

        # Host-precomputed, hoisted ONCE for all layers/heads:
        #   pred — True where the score is replaced (in-batch masked OR a
        #          different batch element inside the fused slab)
        #   fill — -1e9 for in-batch masked (torch masked_fill semantics),
        #          -inf for cross-batch entries so they never contribute,
        #          even for fully-masked rows.
        pred = mask_ref[0] != 0.0          # (R, R) bool
        fill = mask_ref[1]                 # (R, R) f32

        for l in range(n_layers):          # static unroll (n_layers == 2)
            r = ROWS_PER_LAYER * l
            # ---- sublayer 0: pre-LN multi-head self-attention + residual ----
            xn = _layernorm(x, vec_ref[r + 0:r + 1, 0:D], vec_ref[r + 1:r + 2, 0:D])
            qkv = dot(xn, wmain_ref[l, :, 0:3 * D]) + vec_ref[r + 2:r + 3, 0:3 * D]
            q = qkv[:, 0:D] * scale                       # scale folded in once
            k = qkv[:, D:2 * D]
            v = qkv[:, 2 * D:3 * D]
            for h in range(n_heads):
                lo = h * dk
                s_h = dot_nt(q[:, lo:lo + dk], k[:, lo:lo + dk])
                s_h = jnp.where(pred, fill, s_h)
                p_h = _softmax_last(s_h)
                # "concat heads" = static lane-slice writes into a VMEM scratch
                ctx_sc[:, lo:lo + dk] = dot(p_h, v[:, lo:lo + dk])
            attn = dot(ctx_sc[...], wmain_ref[l, :, SLOT:SLOT + D]) \
                   + vec_ref[r + 3:r + 4, 0:D]
            x = x + attn                                   # dropout == identity (eval)

            # ---- sublayer 1: pre-LN position-wise FFN + residual ----
            xn = _layernorm(x, vec_ref[r + 4:r + 5, 0:D], vec_ref[r + 5:r + 6, 0:D])
            h1 = jnp.maximum(
                dot(xn, wmain_ref[l, :, 2 * SLOT:2 * SLOT + F])
                + vec_ref[r + 6:r + 7, 0:F], 0.0)
            x = x + (dot(h1, wff2_ref[l]) + vec_ref[r + 7:r + 8, 0:D])

        # ---- final LayerNorm, single store ----
        rf = ROWS_PER_LAYER * n_layers
        o_ref[0] = _layernorm(x, vec_ref[rf:rf + 1, 0:D], vec_ref[rf + 1:rf + 2, 0:D])

    return kernel


# ---- wrapper helpers ---------------------------------------------------------
def _const_spec(shape):
    # full-array block, constant block index -> one DMA into VMEM.
    n = len(shape)
    return pl.BlockSpec(shape, lambda g, _n=n: (0,) * _n)


def _default_num_blocks(B):
    # v7x has two TensorCores per chip: give each one a batch shard.  v5e/v6e
    # have a single TC, where extra grid steps are pure serial overhead.
    try:
        kind = jax.devices()[0].device_kind.lower()
        if ("v7" in kind or "7x" in kind) and B % 2 == 0:
            return 2
    except Exception:
        pass
    return 1


def _build_mask_pack(mask, attn_mask, num_blocks, bpb):
    """Host-side block-diagonal [pred, fill] pair for the fused batch slab."""
    B, S = mask.shape
    keep = mask[:, None, :].astype(bool)                              # (B,1,S)
    if attn_mask:
        sub = (jnp.triu(jnp.ones((S, S), jnp.int32), k=1) == 0)       # subsequent_mask
        keep = keep & sub[None, :, :]                                  # (B,S,S)
    else:
        keep = jnp.broadcast_to(keep, (B, S, S))
    keep = keep.astype(jnp.float32).reshape(num_blocks, bpb, S, S)
    eye = jnp.eye(bpb, dtype=jnp.float32)
    R = bpb * S
    # keep_full[g, a*S+i, c*S+j] = eye[a,c] * keep[g,a,i,j]
    keep_full = jnp.einsum('ac,gaij->gaicj', eye, keep).reshape(num_blocks, R, R)
    same = jnp.einsum('ac,ij->aicj', eye,
                      jnp.ones((S, S), jnp.float32)).reshape(R, R)
    pred = (keep_full == 0).astype(jnp.float32)                        # 1 => replace
    fill = jnp.where(same[None] > 0, jnp.float32(NEG_INF),
                     jnp.float32(-jnp.inf))                            # (1,R,R)
    fill = jnp.broadcast_to(fill, pred.shape)
    return jnp.stack([pred, fill], axis=1).reshape(num_blocks * 2, R, R)


def encoder_forward(x, mask, params, attn_mask=False, num_blocks=None,
                    mxu_bf16=False):
    """Mirrors Encoder.forward(x, mask, attn_mask=...) with permute=None, bias=None."""
    # TODO(synk): the optional `permute` / `bias` layer arguments of the original
    # forward are not defined in the provided source; only the standard path is done.
    B, S, D = x.shape
    if num_blocks is None:
        num_blocks = _default_num_blocks(B)
    assert B % num_blocks == 0
    bpb = B // num_blocks
    R = bpb * S

    mask_pack = _build_mask_pack(mask, attn_mask, num_blocks, bpb)     # (nb*2, R, R)
    x2 = x.astype(jnp.float32).reshape(num_blocks, R, D)

    kernel = _make_kernel(N_LAYERS, N_HEADS, mxu_bf16)
    out = pl.pallas_call(
        kernel,
        out_shape=jax.ShapeDtypeStruct((num_blocks, R, D), jnp.float32),
        grid=(num_blocks,),
        in_specs=[
            pl.BlockSpec((1, R, D), lambda g: (g, 0, 0)),     # activation slab
            pl.BlockSpec((2, R, R), lambda g: (g, 0, 0)),     # [pred, fill] mask pair
            _const_spec(params["vec_pack"].shape),            # all vector params
            _const_spec(params["w_main"].shape),              # W_qkv | W_o | W_ff1
            _const_spec(params["w_ff2"].shape),               # W_ff2
        ],
        out_specs=pl.BlockSpec((1, R, D), lambda g: (g, 0, 0)),
        scratch_shapes=[pltpu.VMEM((R, D_MODEL), jnp.float32)],   # head-concat scratch
        compiler_params=pltpu.CompilerParams(
            dimension_semantics=("parallel",)),               # 2 TCs on v7x
    )(x2, mask_pack, params["vec_pack"], params["w_main"], params["w_ff2"])
    return out.reshape(B, S, D)


# ---- parameter packing / init (matches Encoder._init_weights) ----------------
def pack_params(u):
    L = N_LAYERS
    vec = jnp.zeros((ROWS_PER_LAYER * L + 2, VEC_W), jnp.float32)
    wm = jnp.zeros((L, D_MODEL, 3 * SLOT), jnp.float32)
    for l in range(L):
        r = ROWS_PER_LAYER * l
        vec = vec.at[r + 0, :D_MODEL].set(u["ln_scale"][l, 0])
        vec = vec.at[r + 1, :D_MODEL].set(u["ln_bias"][l, 0])
        vec = vec.at[r + 2, :3 * D_MODEL].set(u["b_qkv"][l])
        vec = vec.at[r + 3, :D_MODEL].set(u["b_o"][l])
        vec = vec.at[r + 4, :D_MODEL].set(u["ln_scale"][l, 1])
        vec = vec.at[r + 5, :D_MODEL].set(u["ln_bias"][l, 1])
        vec = vec.at[r + 6, :D_FF].set(u["b_ff1"][l])
        vec = vec.at[r + 7, :D_MODEL].set(u["b_ff2"][l])
        wm = wm.at[l, :, 0:3 * D_MODEL].set(u["w_qkv"][l])
        wm = wm.at[l, :, SLOT:SLOT + D_MODEL].set(u["w_o"][l])
        wm = wm.at[l, :, 2 * SLOT:2 * SLOT + D_FF].set(u["w_ff1"][l])
    vec = vec.at[ROWS_PER_LAYER * L + 0, :D_MODEL].set(u["final_a"])
    vec = vec.at[ROWS_PER_LAYER * L + 1, :D_MODEL].set(u["final_b"])
    return {"vec_pack": vec, "w_main": wm, "w_ff2": u["w_ff2"]}


def init_params(key):
    k1, k2, k3, k4, knext = jax.random.split(key, 5)

    def nrm(k, shape):
        return 0.02 * jax.random.normal(k, shape, jnp.float32)   # N(0, 0.02)

    unpacked = {
        # custom LayerNorm params: ones / zeros (not touched by _init_weights)
        "ln_scale": jnp.ones((N_LAYERS, 2, D_MODEL), jnp.float32),
        "ln_bias": jnp.zeros((N_LAYERS, 2, D_MODEL), jnp.float32),
        # fused [W_q | W_k | W_v] stored [in, out]; nn.Linear biases zero
        "w_qkv": nrm(k1, (N_LAYERS, D_MODEL, 3 * D_MODEL)),
        "b_qkv": jnp.zeros((N_LAYERS, 3 * D_MODEL), jnp.float32),
        "w_o": nrm(k2, (N_LAYERS, D_MODEL, D_MODEL)),
        "b_o": jnp.zeros((N_LAYERS, D_MODEL), jnp.float32),
        "w_ff1": nrm(k3, (N_LAYERS, D_MODEL, D_FF)),
        "b_ff1": jnp.zeros((N_LAYERS, D_FF), jnp.float32),
        "w_ff2": nrm(k4, (N_LAYERS, D_FF, D_MODEL)),
        "b_ff2": jnp.zeros((N_LAYERS, D_MODEL), jnp.float32),
        # final LayerNorm
        "final_a": jnp.ones((D_MODEL,), jnp.float32),
        "final_b": jnp.zeros((D_MODEL,), jnp.float32),
    }
    return pack_params(unpacked), knext


if __name__ == "__main__":
    B, S = 2, 8
    key = jax.random.PRNGKey(0)
    params, key = init_params(key)

    key, kx = jax.random.split(key)
    x = jax.random.normal(kx, (B, S, D_MODEL), jnp.float32)
    # padding mask: batch 0 fully valid, batch 1 has last two positions padded
    mask = jnp.ones((B, S), jnp.int32).at[1, 6:].set(0)

    # padding-mask path (mask.unsqueeze(-2)); default block split (device-aware)
    out = encoder_forward(x, mask, params, attn_mask=False)
    jax.block_until_ready(out)
    assert out.shape == (B, S, D_MODEL)
    assert bool(jnp.all(jnp.isfinite(out)))

    # cross-check: fused single-step slab vs per-batch grid split give same result
    out_fused = encoder_forward(x, mask, params, attn_mask=False, num_blocks=1)
    out_split = encoder_forward(x, mask, params, attn_mask=False, num_blocks=2)
    jax.block_until_ready((out_fused, out_split))
    assert bool(jnp.allclose(out_fused, out_split, atol=1e-5, rtol=1e-5))

    # padding + subsequent-mask path (attn_mask=True)
    out2 = encoder_forward(x, mask, params, attn_mask=True)
    jax.block_until_ready(out2)
    assert out2.shape == (B, S, D_MODEL)
    assert bool(jnp.all(jnp.isfinite(out2)))

    print("KERNEL_OK")
</pallas_src>

<mosaic_0001>
module attributes {stable_mosaic.version = 11 : i64} {
  func.func @kernel(%arg0: i32, %arg1: memref<1x16x32xf32, #tpu.memory_space<vmem>>, %arg2: memref<2x16x16xf32, #tpu.memory_space<vmem>>, %arg3: memref<18x96xf32, #tpu.memory_space<vmem>>, %arg4: memref<2x32x384xf32, #tpu.memory_space<vmem>>, %arg5: memref<2x64x32xf32, #tpu.memory_space<vmem>>, %arg6: memref<1x16x32xf32, #tpu.memory_space<vmem>>, %arg7: memref<16x32xf32, #tpu.memory_space<vmem>>) attributes {dimension_semantics = [#tpu.dimension_semantics<parallel>], iteration_bounds = array<i64: 1>, scalar_prefetch = 0 : i64, scratch_operands = 1 : i64, tpu.core_type = #tpu.core_type<tc>, window_params = [{transform_indices = @transform_0, window_bounds = array<i64: 1, 16, 32>}, {transform_indices = @transform_1, window_bounds = array<i64: 2, 16, 16>}, {pipeline_mode = #tpu.pipeline_mode<synchronous>, transform_indices = @transform_2, window_bounds = array<i64: 18, 96>}, {pipeline_mode = #tpu.pipeline_mode<synchronous>, transform_indices = @transform_3, window_bounds = array<i64: 2, 32, 384>}, {pipeline_mode = #tpu.pipeline_mode<synchronous>, transform_indices = @transform_4, window_bounds = array<i64: 2, 64, 32>}, {transform_indices = @transform_5, window_bounds = array<i64: 1, 16, 32>}]} {
    %c0 = arith.constant 0 : index
    %c0_0 = arith.constant 0 : index
    %c0_1 = arith.constant 0 : index
    %0 = vector.load %arg1[%c0, %c0_0, %c0_1] : memref<1x16x32xf32, #tpu.memory_space<vmem>>, vector<1x16x32xf32>
    %1 = vector.shape_cast %0 : vector<1x16x32xf32> to vector<16x32xf32>
    %c0_2 = arith.constant 0 : index
    %c0_3 = arith.constant 0 : index
    %c0_4 = arith.constant 0 : index
    %2 = vector.load %arg2[%c0_2, %c0_3, %c0_4] : memref<2x16x16xf32, #tpu.memory_space<vmem>>, vector<1x16x16xf32>
    %3 = vector.shape_cast %2 : vector<1x16x16xf32> to vector<16x16xf32>
    %cst = arith.constant 0.000000e+00 : f32
    %4 = vector.broadcast %cst : f32 to vector<16x16xf32>
    %5 = arith.cmpf one, %3, %4 : vector<16x16xf32>
    %c1 = arith.constant 1 : index
    %c0_5 = arith.constant 0 : index
    %c0_6 = arith.constant 0 : index
    %6 = vector.load %arg2[%c1, %c0_5, %c0_6] : memref<2x16x16xf32, #tpu.memory_space<vmem>>, vector<1x16x16xf32>
    %7 = vector.shape_cast %6 : vector<1x16x16xf32> to vector<16x16xf32>
    %c0_7 = arith.constant 0 : index
    %c0_8 = arith.constant 0 : index
    %8 = vector.load %arg3[%c0_7, %c0_8] : memref<18x96xf32, #tpu.memory_space<vmem>>, vector<1x32xf32>
    %c1_9 = arith.constant 1 : index
    %c0_10 = arith.constant 0 : index
    %9 = vector.load %arg3[%c1_9, %c0_10] : memref<18x96xf32, #tpu.memory_space<vmem>>, vector<1x32xf32>
    %cst_11 = arith.constant dense<0.000000e+00> : vector<16xf32>
    %10 = vector.multi_reduction <add>, %1, %cst_11 [1] : vector<16x32xf32> to vector<16xf32>
    %11 = vector.shape_cast %10 : vector<16xf32> to vector<16x1xf32>
    %cst_12 = arith.constant 3.200000e+01 : f32
    %12 = vector.broadcast %cst_12 : f32 to vector<16x1xf32>
    %13 = arith.divf %11, %12 : vector<16x1xf32>
    %14 = vector.broadcast %13 : vector<16x1xf32> to vector<16x32xf32>
    %15 = arith.subf %1, %14 : vector<16x32xf32>
    %16 = arith.mulf %15, %15 : vector<16x32xf32>
    %cst_13 = arith.constant dense<0.000000e+00> : vector<16xf32>
    %17 = vector.multi_reduction <add>, %16, %cst_13 [1] : vector<16x32xf32> to vector<16xf32>
    %18 = vector.shape_cast %17 : vector<16xf32> to vector<16x1xf32>
    %cst_14 = arith.constant 0.0322580636 : f32
    %19 = vector.broadcast %cst_14 : f32 to vector<16x1xf32>
    %20 = arith.mulf %18, %19 : vector<16x1xf32>
    %21 = math.sqrt %20 : vector<16x1xf32>
    %cst_15 = arith.constant 9.99999997E-7 : f32
    %22 = vector.broadcast %cst_15 : f32 to vector<16x1xf32>
    %23 = arith.addf %21, %22 : vector<16x1xf32>
    %24 = vector.broadcast %23 : vector<16x1xf32> to vector<16x32xf32>
    %25 = arith.divf %15, %24 : vector<16x32xf32>
    %26 = vector.broadcast %8 : vector<1x32xf32> to vector<16x32xf32>
    %27 = arith.mulf %26, %25 : vector<16x32xf32>
    %28 = vector.broadcast %9 : vector<1x32xf32> to vector<16x32xf32>
    %29 = arith.addf %27, %28 : vector<16x32xf32>
    %c0_16 = arith.constant 0 : index
    %c0_17 = arith.constant 0 : index
    %c0_18 = arith.constant 0 : index
    %30 = vector.load %arg4[%c0_16, %c0_17, %c0_18] : memref<2x32x384xf32, #tpu.memory_space<vmem>>, vector<1x32x96xf32>
    %31 = vector.shape_cast %30 : vector<1x32x96xf32> to vector<32x96xf32>
    %cst_19 = arith.constant dense<0.000000e+00> : vector<16x96xf32>
    %32 = tpu.matmul %29, %31, %cst_19 {dimension_numbers = #tpu.dot_dimension_numbers<[1], [0], [0], [1], [0, 0, 1, 1], [], []>} : vector<16x32xf32>, vector<32x96xf32>, vector<16x96xf32> -> vector<16x96xf32>
    %c2 = arith.constant 2 : index
    %c0_20 = arith.constant 0 : index
    %33 = vector.load %arg3[%c2, %c0_20] : memref<18x96xf32, #tpu.memory_space<vmem>>, vector<1x96xf32>
    %34 = vector.broadcast %33 : vector<1x96xf32> to vector<16x96xf32>
    %35 = arith.addf %32, %34 : vector<16x96xf32>
    %36 = vector.extract_strided_slice %35 {offsets = [0, 0], sizes = [16, 32], strides = [1, 1]} : vector<16x96xf32> to vector<16x32xf32>
    %cst_21 = arith.constant 0.353553385 : f32
    %37 = vector.broadcast %cst_21 : f32 to vector<16x32xf32>
    %38 = arith.mulf %36, %37 : vector<16x32xf32>
    %39 = vector.extract_strided_slice %35 {offsets = [0, 32], sizes = [16, 32], strides = [1, 1]} : vector<16x96xf32> to vector<16x32xf32>
    %40 = vector.extract_strided_slice %35 {offsets = [0, 64], sizes = [16, 32], strides = [1, 1]} : vector<16x96xf32> to vector<16x32xf32>
    %41 = vector.extract_strided_slice %38 {offsets = [0, 0], sizes = [16, 8], strides = [1, 1]} : vector<16x32xf32> to vector<16x8xf32>
    %42 = vector.extract_strided_slice %39 {offsets = [0, 0], sizes = [16, 8], strides = [1, 1]} : vector<16x32xf32> to vector<16x8xf32>
    %cst_22 = arith.constant dense<0.000000e+00> : vector<16x16xf32>
    %43 = tpu.matmul %41, %42, %cst_22 {dimension_numbers = #tpu.dot_dimension_numbers<[1], [1], [0], [0], [0, 0, 1, 0], [], []>} : vector<16x8xf32>, vector<16x8xf32>, vector<16x16xf32> -> vector<16x16xf32>
    %44 = arith.select %5, %7, %43 : vector<16x16xi1>, vector<16x16xf32>
    %cst_23 = arith.constant dense<0xFF800000> : vector<16xf32>
    %45 = vector.multi_reduction <maximumf>, %44, %cst_23 [1] : vector<16x16xf32> to vector<16xf32>
    %46 = vector.shape_cast %45 : vector<16xf32> to vector<16x1xf32>
    %47 = vector.broadcast %46 : vector<16x1xf32> to vector<16x16xf32>
    %48 = arith.subf %44, %47 : vector<16x16xf32>
    %49 = math.exp %48 : vector<16x16xf32>
    %cst_24 = arith.constant dense<0.000000e+00> : vector<16xf32>
    %50 = vector.multi_reduction <add>, %49, %cst_24 [1] : vector<16x16xf32> to vector<16xf32>
    %51 = vector.shape_cast %50 : vector<16xf32> to vector<16x1xf32>
    %52 = vector.broadcast %51 : vector<16x1xf32> to vector<16x16xf32>
    %53 = arith.divf %49, %52 : vector<16x16xf32>
    %54 = vector.extract_strided_slice %40 {offsets = [0, 0], sizes = [16, 8], strides = [1, 1]} : vector<16x32xf32> to vector<16x8xf32>
    %cst_25 = arith.constant dense<0.000000e+00> : vector<16x8xf32>
    %55 = tpu.matmul %53, %54, %cst_25 {dimension_numbers = #tpu.dot_dimension_numbers<[1], [0], [0], [1], [0, 0, 1, 1], [], []>} : vector<16x16xf32>, vector<16x8xf32>, vector<16x8xf32> -> vector<16x8xf32>
    %c0_26 = arith.constant 0 : index
    %c0_27 = arith.constant 0 : index
    %56 = vector.load %arg7[%c0_26, %c0_27] : memref<16x32xf32, #tpu.memory_space<vmem>>, vector<16x8xf32>
    tpu.vector_store %arg7[%c0_26, %c0_27], %55 {strides = array<i32>} : memref<16x32xf32, #tpu.memory_space<vmem>>, vector<16x8xf32>,
    %57 = vector.extract_strided_slice %38 {offsets = [0, 8], sizes = [16, 8], strides = [1, 1]} : vector<16x32xf32> to vector<16x8xf32>
    %58 = vector.extract_strided_slice %39 {offsets = [0, 8], sizes = [16, 8], strides = [1, 1]} : vector<16x32xf32> to vector<16x8xf32>
    %cst_28 = arith.constant dense<0.000000e+00> : vector<16x16xf32>
    %59 = tpu.matmul %57, %58, %cst_28 {dimension_numbers = #tpu.dot_dimension_numbers<[1], [1], [0], [0], [0, 0, 1, 0], [], []>} : vector<16x8xf32>, vector<16x8xf32>, vector<16x16xf32> -> vector<16x16xf32>
    %60 = arith.select %5, %7, %59 : vector<16x16xi1>, vector<16x16xf32>
    %cst_29 = arith.constant dense<0xFF800000> : vector<16xf32>
    %61 = vector.multi_reduction <maximumf>, %60, %cst_29 [1] : vector<16x16xf32> to vector<16xf32>
    %62 = vector.shape_cast %61 : vector<16xf32> to vector<16x1xf32>
    %63 = vector.broadcast %62 : vector<16x1xf32> to vector<16x16xf32>
    %64 = arith.subf %60, %63 : vector<16x16xf32>
    %65 = math.exp %64 : vector<16x16xf32>
    %cst_30 = arith.constant dense<0.000000e+00> : vector<16xf32>
    %66 = vector.multi_reduction <add>, %65, %cst_30 [1] : vector<16x16xf32> to vector<16xf32>
    %67 = vector.shape_cast %66 : vector<16xf32> to vector<16x1xf32>
    %68 = vector.broadcast %67 : vector<16x1xf32> to vector<16x16xf32>
    %69 = arith.divf %65, %68 : vector<16x16xf32>
    %70 = vector.extract_strided_slice %40 {offsets = [0, 8], sizes = [16, 8], strides = [1, 1]} : vector<16x32xf32> to vector<16x8xf32>
    %cst_31 = arith.constant dense<0.000000e+00> : vector<16x8xf32>
    %71 = tpu.matmul %69, %70, %cst_31 {dimension_numbers = #tpu.dot_dimension_numbers<[1], [0], [0], [1], [0, 0, 1, 1], [], []>} : vector<16x16xf32>, vector<16x8xf32>, vector<16x8xf32> -> vector<16x8xf32>
    %c0_32 = arith.constant 0 : index
    %c8 = arith.constant 8 : index
    %72 = vector.load %arg7[%c0_32, %c8] : memref<16x32xf32, #tpu.memory_space<vmem>>, vector<16x8xf32>
    tpu.vector_store %arg7[%c0_32, %c8], %71 {strides = array<i32>} : memref<16x32xf32, #tpu.memory_space<vmem>>, vector<16x8xf32>,
    %73 = vector.extract_strided_slice %38 {offsets = [0, 16], sizes = [16, 8], strides = [1, 1]} : vector<16x32xf32> to vector<16x8xf32>
    %74 = vector.extract_strided_slice %39 {offsets = [0, 16], sizes = [16, 8], strides = [1, 1]} : vector<16x32xf32> to vector<16x8xf32>
    %cst_33 = arith.constant dense<0.000000e+00> : vector<16x16xf32>
    %75 = tpu.matmul %73, %74, %cst_33 {dimension_numbers = #tpu.dot_dimension_numbers<[1], [1], [0], [0], [0, 0, 1, 0], [], []>} : vector<16x8xf32>, vector<16x8xf32>, vector<16x16xf32> -> vector<16x16xf32>
    %76 = arith.select %5, %7, %75 : vector<16x16xi1>, vector<16x16xf32>
    %cst_34 = arith.constant dense<0xFF800000> : vector<16xf32>
    %77 = vector.multi_reduction <maximumf>, %76, %cst_34 [1] : vector<16x16xf32> to vector<16xf32>
    %78 = vector.shape_cast %77 : vector<16xf32> to vector<16x1xf32>
    %79 = vector.broadcast %78 : vector<16x1xf32> to vector<16x16xf32>
    %80 = arith.subf %76, %79 : vector<16x16xf32>
    %81 = math.exp %80 : vector<16x16xf32>
    %cst_35 = arith.constant dense<0.000000e+00> : vector<16xf32>
    %82 = vector.multi_reduction <add>, %81, %cst_35 [1] : vector<16x16xf32> to vector<16xf32>
    %83 = vector.shape_cast %82 : vector<16xf32> to vector<16x1xf32>
    %84 = vector.broadcast %83 : vector<16x1xf32> to vector<16x16xf32>
    %85 = arith.divf %81, %84 : vector<16x16xf32>
    %86 = vector.extract_strided_slice %40 {offsets = [0, 16], sizes = [16, 8], strides = [1, 1]} : vector<16x32xf32> to vector<16x8xf32>
    %cst_36 = arith.constant dense<0.000000e+00> : vector<16x8xf32>
    %87 = tpu.matmul %85, %86, %cst_36 {dimension_numbers = #tpu.dot_dimension_numbers<[1], [0], [0], [1], [0, 0, 1, 1], [], []>} : vector<16x16xf32>, vector<16x8xf32>, vector<16x8xf32> -> vector<16x8xf32>
    %c0_37 = arith.constant 0 : index
    %c16 = arith.constant 16 : index
    %88 = vector.load %arg7[%c0_37, %c16] : memref<16x32xf32, #tpu.memory_space<vmem>>, vector<16x8xf32>
    tpu.vector_store %arg7[%c0_37, %c16], %87 {strides = array<i32>} : memref<16x32xf32, #tpu.memory_space<vmem>>, vector<16x8xf32>,
    %89 = vector.extract_strided_slice %38 {offsets = [0, 24], sizes = [16, 8], strides = [1, 1]} : vector<16x32xf32> to vector<16x8xf32>
    %90 = vector.extract_strided_slice %39 {offsets = [0, 24], sizes = [16, 8], strides = [1, 1]} : vector<16x32xf32> to vector<16x8xf32>
    %cst_38 = arith.constant dense<0.000000e+00> : vector<16x16xf32>
    %91 = tpu.matmul %89, %90, %cst_38 {dimension_numbers = #tpu.dot_dimension_numbers<[1], [1], [0], [0], [0, 0, 1, 0], [], []>} : vector<16x8xf32>, vector<16x8xf32>, vector<16x16xf32> -> vector<16x16xf32>
    %92 = arith.select %5, %7, %91 : vector<16x16xi1>, vector<16x16xf32>
    %cst_39 = arith.constant dense<0xFF800000> : vector<16xf32>
    %93 = vector.multi_reduction <maximumf>, %92, %cst_39 [1] : vector<16x16xf32> to vector<16xf32>
    %94 = vector.shape_cast %93 : vector<16xf32> to vector<16x1xf32>
    %95 = vector.broadcast %94 : vector<16x1xf32> to vector<16x16xf32>
    %96 = arith.subf %92, %95 : vector<16x16xf32>
    %97 = math.exp %96 : vector<16x16xf32>
    %cst_40 = arith.constant dense<0.000000e+00> : vector<16xf32>
    %98 = vector.multi_reduction <add>, %97, %cst_40 [1] : vector<16x16xf32> to vector<16xf32>
    %99 = vector.shape_cast %98 : vector<16xf32> to vector<16x1xf32>
    %100 = vector.broadcast %99 : vector<16x1xf32> to vector<16x16xf32>
    %101 = arith.divf %97, %100 : vector<16x16xf32>
    %102 = vector.extract_strided_slice %40 {offsets = [0, 24], sizes = [16, 8], strides = [1, 1]} : vector<16x32xf32> to vector<16x8xf32>
    %cst_41 = arith.constant dense<0.000000e+00> : vector<16x8xf32>
    %103 = tpu.matmul %101, %102, %cst_41 {dimension_numbers = #tpu.dot_dimension_numbers<[1], [0], [0], [1], [0, 0, 1, 1], [], []>} : vector<16x16xf32>, vector<16x8xf32>, vector<16x8xf32> -> vector<16x8xf32>
    %c0_42 = arith.constant 0 : index
    %c24 = arith.constant 24 : index
    %104 = vector.load %arg7[%c0_42, %c24] : memref<16x32xf32, #tpu.memory_space<vmem>>, vector<16x8xf32>
    tpu.vector_store %arg7[%c0_42, %c24], %103 {strides = array<i32>} : memref<16x32xf32, #tpu.memory_space<vmem>>, vector<16x8xf32>,
    %c0_43 = arith.constant 0 : index
    %c0_44 = arith.constant 0 : index
    %105 = vector.load %arg7[%c0_43, %c0_44] : memref<16x32xf32, #tpu.memory_space<vmem>>, vector<16x32xf32>
    %c0_45 = arith.constant 0 : index
    %c0_46 = arith.constant 0 : index
    %c128 = arith.constant 128 : index
    %106 = vector.load %arg4[%c0_45, %c0_46, %c128] : memref<2x32x384xf32, #tpu.memory_space<vmem>>, vector<1x32x32xf32>
    %107 = vector.shape_cast %106 : vector<1x32x32xf32> to vector<32x32xf32>
    %cst_47 = arith.constant dense<0.000000e+00> : vector<16x32xf32>
    %108 = tpu.matmul %105, %107, %cst_47 {dimension_numbers = #tpu.dot_dimension_numbers<[1], [0], [0], [1], [0, 0, 1, 1], [], []>} : vector<16x32xf32>, vector<32x32xf32>, vector<16x32xf32> -> vector<16x32xf32>
    %c3 = arith.constant 3 : index
    %c0_48 = arith.constant 0 : index
    %109 = vector.load %arg3[%c3, %c0_48] : memref<18x96xf32, #tpu.memory_space<vmem>>, vector<1x32xf32>
    %110 = vector.broadcast %109 : vector<1x32xf32> to vector<16x32xf32>
    %111 = arith.addf %108, %110 : vector<16x32xf32>
    %112 = arith.addf %1, %111 : vector<16x32xf32>
    %c4 = arith.constant 4 : index
    %c0_49 = arith.constant 0 : index
    %113 = vector.load %arg3[%c4, %c0_49] : memref<18x96xf32, #tpu.memory_space<vmem>>, vector<1x32xf32>
    %c5 = arith.constant 5 : index
    %c0_50 = arith.constant 0 : index
    %114 = vector.load %arg3[%c5, %c0_50] : memref<18x96xf32, #tpu.memory_space<vmem>>, vector<1x32xf32>
    %cst_51 = arith.constant dense<0.000000e+00> : vector<16xf32>
    %115 = vector.multi_reduction <add>, %112, %cst_51 [1] : vector<16x32xf32> to vector<16xf32>
    %116 = vector.shape_cast %115 : vector<16xf32> to vector<16x1xf32>
    %cst_52 = arith.constant 3.200000e+01 : f32
    %117 = vector.broadcast %cst_52 : f32 to vector<16x1xf32>
    %118 = arith.divf %116, %117 : vector<16x1xf32>
    %119 = vector.broadcast %118 : vector<16x1xf32> to vector<16x32xf32>
    %120 = arith.subf %112, %119 : vector<16x32xf32>
    %121 = arith.mulf %120, %120 : vector<16x32xf32>
    %cst_53 = arith.constant dense<0.000000e+00> : vector<16xf32>
    %122 = vector.multi_reduction <add>, %121, %cst_53 [1] : vector<16x32xf32> to vector<16xf32>
    %123 = vector.shape_cast %122 : vector<16xf32> to vector<16x1xf32>
    %cst_54 = arith.constant 0.0322580636 : f32
    %124 = vector.broadcast %cst_54 : f32 to vector<16x1xf32>
    %125 = arith.mulf %123, %124 : vector<16x1xf32>
    %126 = math.sqrt %125 : vector<16x1xf32>
    %cst_55 = arith.constant 9.99999997E-7 : f32
    %127 = vector.broadcast %cst_55 : f32 to vector<16x1xf32>
    %128 = arith.addf %126, %127 : vector<16x1xf32>
    %129 = vector.broadcast %128 : vector<16x1xf32> to vector<16x32xf32>
    %130 = arith.divf %120, %129 : vector<16x32xf32>
    %131 = vector.broadcast %113 : vector<1x32xf32> to vector<16x32xf32>
    %132 = arith.mulf %131, %130 : vector<16x32xf32>
    %133 = vector.broadcast %114 : vector<1x32xf32> to vector<16x32xf32>
    %134 = arith.addf %132, %133 : vector<16x32xf32>
    %c0_56 = arith.constant 0 : index
    %c0_57 = arith.constant 0 : index
    %c256 = arith.constant 256 : index
    %135 = vector.load %arg4[%c0_56, %c0_57, %c256] : memref<2x32x384xf32, #tpu.memory_space<vmem>>, vector<1x32x64xf32>
    %136 = vector.shape_cast %135 : vector<1x32x64xf32> to vector<32x64xf32>
    %cst_58 = arith.constant dense<0.000000e+00> : vector<16x64xf32>
    %137 = tpu.matmul %134, %136, %cst_58 {dimension_numbers = #tpu.dot_dimension_numbers<[1], [0], [0], [1], [0, 0, 1, 1], [], []>} : vector<16x32xf32>, vector<32x64xf32>, vector<16x64xf32> -> vector<16x64xf32>
    %c6 = arith.constant 6 : index
    %c0_59 = arith.constant 0 : index
    %138 = vector.load %arg3[%c6, %c0_59] : memref<18x96xf32, #tpu.memory_space<vmem>>, vector<1x64xf32>
    %139 = vector.broadcast %138 : vector<1x64xf32> to vector<16x64xf32>
    %140 = arith.addf %137, %139 : vector<16x64xf32>
    %cst_60 = arith.constant 0.000000e+00 : f32
    %141 = vector.broadcast %cst_60 : f32 to vector<16x64xf32>
    %142 = arith.maximumf %140, %141 : vector<16x64xf32>
    %c0_61 = arith.constant 0 : index
    %c0_62 = arith.constant 0 : index
    %c0_63 = arith.constant 0 : index
    %143 = vector.load %arg5[%c0_61, %c0_62, %c0_63] : memref<2x64x32xf32, #tpu.memory_space<vmem>>, vector<1x64x32xf32>
    %144 = vector.shape_cast %143 : vector<1x64x32xf32> to vector<64x32xf32>
    %cst_64 = arith.constant dense<0.000000e+00> : vector<16x32xf32>
    %145 = tpu.matmul %142, %144, %cst_64 {dimension_numbers = #tpu.dot_dimension_numbers<[1], [0], [0], [1], [0, 0, 1, 1], [], []>} : vector<16x64xf32>, vector<64x32xf32>, vector<16x32xf32> -> vector<16x32xf32>
    %c7 = arith.constant 7 : index
    %c0_65 = arith.constant 0 : index
    %146 = vector.load %arg3[%c7, %c0_65] : memref<18x96xf32, #tpu.memory_space<vmem>>, vector<1x32xf32>
    %147 = vector.broadcast %146 : vector<1x32xf32> to vector<16x32xf32>
    %148 = arith.addf %145, %147 : vector<16x32xf32>
    %149 = arith.addf %112, %148 : vector<16x32xf32>
    %c8_66 = arith.constant 8 : index
    %c0_67 = arith.constant 0 : index
    %150 = vector.load %arg3[%c8_66, %c0_67] : memref<18x96xf32, #tpu.memory_space<vmem>>, vector<1x32xf32>
    %c9 = arith.constant 9 : index
    %c0_68 = arith.constant 0 : index
    %151 = vector.load %arg3[%c9, %c0_68] : memref<18x96xf32, #tpu.memory_space<vmem>>, vector<1x32xf32>
    %cst_69 = arith.constant dense<0.000000e+00> : vector<16xf32>
    %152 = vector.multi_reduction <add>, %149, %cst_69 [1] : vector<16x32xf32> to vector<16xf32>
    %153 = vector.shape_cast %152 : vector<16xf32> to vector<16x1xf32>
    %cst_70 = arith.constant 3.200000e+01 : f32
    %154 = vector.broadcast %cst_70 : f32 to vector<16x1xf32>
    %155 = arith.divf %153, %154 : vector<16x1xf32>
    %156 = vector.broadcast %155 : vector<16x1xf32> to vector<16x32xf32>
    %157 = arith.subf %149, %156 : vector<16x32xf32>
    %158 = arith.mulf %157, %157 : vector<16x32xf32>
    %cst_71 = arith.constant dense<0.000000e+00> : vector<16xf32>
    %159 = vector.multi_reduction <add>, %158, %cst_71 [1] : vector<16x32xf32> to vector<16xf32>
    %160 = vector.shape_cast %159 : vector<16xf32> to vector<16x1xf32>
    %cst_72 = arith.constant 0.0322580636 : f32
    %161 = vector.broadcast %cst_72 : f32 to vector<16x1xf32>
    %162 = arith.mulf %160, %161 : vector<16x1xf32>
    %163 = math.sqrt %162 : vector<16x1xf32>
    %cst_73 = arith.constant 9.99999997E-7 : f32
    %164 = vector.broadcast %cst_73 : f32 to vector<16x1xf32>
    %165 = arith.addf %163, %164 : vector<16x1xf32>
    %166 = vector.broadcast %165 : vector<16x1xf32> to vector<16x32xf32>
    %167 = arith.divf %157, %166 : vector<16x32xf32>
    %168 = vector.broadcast %150 : vector<1x32xf32> to vector<16x32xf32>
    %169 = arith.mulf %168, %167 : vector<16x32xf32>
    %170 = vector.broadcast %151 : vector<1x32xf32> to vector<16x32xf32>
    %171 = arith.addf %169, %170 : vector<16x32xf32>
    %c1_74 = arith.constant 1 : index
    %c0_75 = arith.constant 0 : index
    %c0_76 = arith.constant 0 : index
    %172 = vector.load %arg4[%c1_74, %c0_75, %c0_76] : memref<2x32x384xf32, #tpu.memory_space<vmem>>, vector<1x32x96xf32>
    %173 = vector.shape_cast %172 : vector<1x32x96xf32> to vector<32x96xf32>
    %cst_77 = arith.constant dense<0.000000e+00> : vector<16x96xf32>
    %174 = tpu.matmul %171, %173, %cst_77 {dimension_numbers = #tpu.dot_dimension_numbers<[1], [0], [0], [1], [0, 0, 1, 1], [], []>} : vector<16x32xf32>, vector<32x96xf32>, vector<16x96xf32> -> vector<16x96xf32>
    %c10 = arith.constant 10 : index
    %c0_78 = arith.constant 0 : index
    %175 = vector.load %arg3[%c10, %c0_78] : memref<18x96xf32, #tpu.memory_space<vmem>>, vector<1x96xf32>
    %176 = vector.broadcast %175 : vector<1x96xf32> to vector<16x96xf32>
    %177 = arith.addf %174, %176 : vector<16x96xf32>
    %178 = vector.extract_strided_slice %177 {offsets = [0, 0], sizes = [16, 32], strides = [1, 1]} : vector<16x96xf32> to vector<16x32xf32>
    %cst_79 = arith.constant 0.353553385 : f32
    %179 = vector.broadcast %cst_79 : f32 to vector<16x32xf32>
    %180 = arith.mulf %178, %179 : vector<16x32xf32>
    %181 = vector.extract_strided_slice %177 {offsets = [0, 32], sizes = [16, 32], strides = [1, 1]} : vector<16x96xf32> to vector<16x32xf32>
    %182 = vector.extract_strided_slice %177 {offsets = [0, 64], sizes = [16, 32], strides = [1, 1]} : vector<16x96xf32> to vector<16x32xf32>
    %183 = vector.extract_strided_slice %180 {offsets = [0, 0], sizes = [16, 8], strides = [1, 1]} : vector<16x32xf32> to vector<16x8xf32>
    %184 = vector.extract_strided_slice %181 {offsets = [0, 0], sizes = [16, 8], strides = [1, 1]} : vector<16x32xf32> to vector<16x8xf32>
    %cst_80 = arith.constant dense<0.000000e+00> : vector<16x16xf32>
    %185 = tpu.matmul %183, %184, %cst_80 {dimension_numbers = #tpu.dot_dimension_numbers<[1], [1], [0], [0], [0, 0, 1, 0], [], []>} : vector<16x8xf32>, vector<16x8xf32>, vector<16x16xf32> -> vector<16x16xf32>
    %186 = arith.select %5, %7, %185 : vector<16x16xi1>, vector<16x16xf32>
    %cst_81 = arith.constant dense<0xFF800000> : vector<16xf32>
    %187 = vector.multi_reduction <maximumf>, %186, %cst_81 [1] : vector<16x16xf32> to vector<16xf32>
    %188 = vector.shape_cast %187 : vector<16xf32> to vector<16x1xf32>
    %189 = vector.broadcast %188 : vector<16x1xf32> to vector<16x16xf32>
    %190 = arith.subf %186, %189 : vector<16x16xf32>
    %191 = math.exp %190 : vector<16x16xf32>
    %cst_82 = arith.constant dense<0.000000e+00> : vector<16xf32>
    %192 = vector.multi_reduction <add>, %191, %cst_82 [1] : vector<16x16xf32> to vector<16xf32>
    %193 = vector.shape_cast %192 : vector<16xf32> to vector<16x1xf32>
    %194 = vector.broadcast %193 : vector<16x1xf32> to vector<16x16xf32>
    %195 = arith.divf %191, %194 : vector<16x16xf32>
    %196 = vector.extract_strided_slice %182 {offsets = [0, 0], sizes = [16, 8], strides = [1, 1]} : vector<16x32xf32> to vector<16x8xf32>
    %cst_83 = arith.constant dense<0.000000e+00> : vector<16x8xf32>
    %197 = tpu.matmul %195, %196, %cst_83 {dimension_numbers = #tpu.dot_dimension_numbers<[1], [0], [0], [1], [0, 0, 1, 1], [], []>} : vector<16x16xf32>, vector<16x8xf32>, vector<16x8xf32> -> vector<16x8xf32>
    %c0_84 = arith.constant 0 : index
    %c0_85 = arith.constant 0 : index
    %198 = vector.load %arg7[%c0_84, %c0_85] : memref<16x32xf32, #tpu.memory_space<vmem>>, vector<16x8xf32>
    tpu.vector_store %arg7[%c0_84, %c0_85], %197 {strides = array<i32>} : memref<16x32xf32, #tpu.memory_space<vmem>>, vector<16x8xf32>,
    %199 = vector.extract_strided_slice %180 {offsets = [0, 8], sizes = [16, 8], strides = [1, 1]} : vector<16x32xf32> to vector<16x8xf32>
    %200 = vector.extract_strided_slice %181 {offsets = [0, 8], sizes = [16, 8], strides = [1, 1]} : vector<16x32xf32> to vector<16x8xf32>
    %cst_86 = arith.constant dense<0.000000e+00> : vector<16x16xf32>
    %201 = tpu.matmul %199, %200, %cst_86 {dimension_numbers = #tpu.dot_dimension_numbers<[1], [1], [0], [0], [0, 0, 1, 0], [], []>} : vector<16x8xf32>, vector<16x8xf32>, vector<16x16xf32> -> vector<16x16xf32>
    %202 = arith.select %5, %7, %201 : vector<16x16xi1>, vector<16x16xf32>
    %cst_87 = arith.constant dense<0xFF800000> : vector<16xf32>
    %203 = vector.multi_reduction <maximumf>, %202, %cst_87 [1] : vector<16x16xf32> to vector<16xf32>
    %204 = vector.shape_cast %203 : vector<16xf32> to vector<16x1xf32>
    %205 = vector.broadcast %204 : vector<16x1xf32> to vector<16x16xf32>
    %206 = arith.subf %202, %205 : vector<16x16xf32>
    %207 = math.exp %206 : vector<16x16xf32>
    %cst_88 = arith.constant dense<0.000000e+00> : vector<16xf32>
    %208 = vector.multi_reduction <add>, %207, %cst_88 [1] : vector<16x16xf32> to vector<16xf32>
    %209 = vector.shape_cast %208 : vector<16xf32> to vector<16x1xf32>
    %210 = vector.broadcast %209 : vector<16x1xf32> to vector<16x16xf32>
    %211 = arith.divf %207, %210 : vector<16x16xf32>
    %212 = vector.extract_strided_slice %182 {offsets = [0, 8], sizes = [16, 8], strides = [1, 1]} : vector<16x32xf32> to vector<16x8xf32>
    %cst_89 = arith.constant dense<0.000000e+00> : vector<16x8xf32>
    %213 = tpu.matmul %211, %212, %cst_89 {dimension_numbers = #tpu.dot_dimension_numbers<[1], [0], [0], [1], [0, 0, 1, 1], [], []>} : vector<16x16xf32>, vector<16x8xf32>, vector<16x8xf32> -> vector<16x8xf32>
    %c0_90 = arith.constant 0 : index
    %c8_91 = arith.constant 8 : index
    %214 = vector.load %arg7[%c0_90, %c8_91] : memref<16x32xf32, #tpu.memory_space<vmem>>, vector<16x8xf32>
    tpu.vector_store %arg7[%c0_90, %c8_91], %213 {strides = array<i32>} : memref<16x32xf32, #tpu.memory_space<vmem>>, vector<16x8xf32>,
    %215 = vector.extract_strided_slice %180 {offsets = [0, 16], sizes = [16, 8], strides = [1, 1]} : vector<16x32xf32> to vector<16x8xf32>
    %216 = vector.extract_strided_slice %181 {offsets = [0, 16], sizes = [16, 8], strides = [1, 1]} : vector<16x32xf32> to vector<16x8xf32>
    %cst_92 = arith.constant dense<0.000000e+00> : vector<16x16xf32>
    %217 = tpu.matmul %215, %216, %cst_92 {dimension_numbers = #tpu.dot_dimension_numbers<[1], [1], [0], [0], [0, 0, 1, 0], [], []>} : vector<16x8xf32>, vector<16x8xf32>, vector<16x16xf32> -> vector<16x16xf32>
    %218 = arith.select %5, %7, %217 : vector<16x16xi1>, vector<16x16xf32>
    %cst_93 = arith.constant dense<0xFF800000> : vector<16xf32>
    %219 = vector.multi_reduction <maximumf>, %218, %cst_93 [1] : vector<16x16xf32> to vector<16xf32>
    %220 = vector.shape_cast %219 : vector<16xf32> to vector<16x1xf32>
    %221 = vector.broadcast %220 : vector<16x1xf32> to vector<16x16xf32>
    %222 = arith.subf %218, %221 : vector<16x16xf32>
    %223 = math.exp %222 : vector<16x16xf32>
    %cst_94 = arith.constant dense<0.000000e+00> : vector<16xf32>
    %224 = vector.multi_reduction <add>, %223, %cst_94 [1] : vector<16x16xf32> to vector<16xf32>
    %225 = vector.shape_cast %224 : vector<16xf32> to vector<16x1xf32>
    %226 = vector.broadcast %225 : vector<16x1xf32> to vector<16x16xf32>
    %227 = arith.divf %223, %226 : vector<16x16xf32>
    %228 = vector.extract_strided_slice %182 {offsets = [0, 16], sizes = [16, 8], strides = [1, 1]} : vector<16x32xf32> to vector<16x8xf32>
    %cst_95 = arith.constant dense<0.000000e+00> : vector<16x8xf32>
    %229 = tpu.matmul %227, %228, %cst_95 {dimension_numbers = #tpu.dot_dimension_numbers<[1], [0], [0], [1], [0, 0, 1, 1], [], []>} : vector<16x16xf32>, vector<16x8xf32>, vector<16x8xf32> -> vector<16x8xf32>
    %c0_96 = arith.constant 0 : index
    %c16_97 = arith.constant 16 : index
    %230 = vector.load %arg7[%c0_96, %c16_97] : memref<16x32xf32, #tpu.memory_space<vmem>>, vector<16x8xf32>
    tpu.vector_store %arg7[%c0_96, %c16_97], %229 {strides = array<i32>} : memref<16x32xf32, #tpu.memory_space<vmem>>, vector<16x8xf32>,
    %231 = vector.extract_strided_slice %180 {offsets = [0, 24], sizes = [16, 8], strides = [1, 1]} : vector<16x32xf32> to vector<16x8xf32>
    %232 = vector.extract_strided_slice %181 {offsets = [0, 24], sizes = [16, 8], strides = [1, 1]} : vector<16x32xf32> to vector<16x8xf32>
    %cst_98 = arith.constant dense<0.000000e+00> : vector<16x16xf32>
    %233 = tpu.matmul %231, %232, %cst_98 {dimension_numbers = #tpu.dot_dimension_numbers<[1], [1], [0], [0], [0, 0, 1, 0], [], []>} : vector<16x8xf32>, vector<16x8xf32>, vector<16x16xf32> -> vector<16x16xf32>
    %234 = arith.select %5, %7, %233 : vector<16x16xi1>, vector<16x16xf32>
    %cst_99 = arith.constant dense<0xFF800000> : vector<16xf32>
    %235 = vector.multi_reduction <maximumf>, %234, %cst_99 [1] : vector<16x16xf32> to vector<16xf32>
    %236 = vector.shape_cast %235 : vector<16xf32> to vector<16x1xf32>
    %237 = vector.broadcast %236 : vector<16x1xf32> to vector<16x16xf32>
    %238 = arith.subf %234, %237 : vector<16x16xf32>
    %239 = math.exp %238 : vector<16x16xf32>
    %cst_100 = arith.constant dense<0.000000e+00> : vector<16xf32>
    %240 = vector.multi_reduction <add>, %239, %cst_100 [1] : vector<16x16xf32> to vector<16xf32>
    %241 = vector.shape_cast %240 : vector<16xf32> to vector<16x1xf32>
    %242 = vector.broadcast %241 : vector<16x1xf32> to vector<16x16xf32>
    %243 = arith.divf %239, %242 : vector<16x16xf32>
    %244 = vector.extract_strided_slice %182 {offsets = [0, 24], sizes = [16, 8], strides = [1, 1]} : vector<16x32xf32> to vector<16x8xf32>
    %cst_101 = arith.constant dense<0.000000e+00> : vector<16x8xf32>
    %245 = tpu.matmul %243, %244, %cst_101 {dimension_numbers = #tpu.dot_dimension_numbers<[1], [0], [0], [1], [0, 0, 1, 1], [], []>} : vector<16x16xf32>, vector<16x8xf32>, vector<16x8xf32> -> vector<16x8xf32>
    %c0_102 = arith.constant 0 : index
    %c24_103 = arith.constant 24 : index
    %246 = vector.load %arg7[%c0_102, %c24_103] : memref<16x32xf32, #tpu.memory_space<vmem>>, vector<16x8xf32>
    tpu.vector_store %arg7[%c0_102, %c24_103], %245 {strides = array<i32>} : memref<16x32xf32, #tpu.memory_space<vmem>>, vector<16x8xf32>,
    %c0_104 = arith.constant 0 : index
    %c0_105 = arith.constant 0 : index
    %247 = vector.load %arg7[%c0_104, %c0_105] : memref<16x32xf32, #tpu.memory_space<vmem>>, vector<16x32xf32>
    %c1_106 = arith.constant 1 : index
    %c0_107 = arith.constant 0 : index
    %c128_108 = arith.constant 128 : index
    %248 = vector.load %arg4[%c1_106, %c0_107, %c128_108] : memref<2x32x384xf32, #tpu.memory_space<vmem>>, vector<1x32x32xf32>
    %249 = vector.shape_cast %248 : vector<1x32x32xf32> to vector<32x32xf32>
    %cst_109 = arith.constant dense<0.000000e+00> : vector<16x32xf32>
    %250 = tpu.matmul %247, %249, %cst_109 {dimension_numbers = #tpu.dot_dimension_numbers<[1], [0], [0], [1], [0, 0, 1, 1], [], []>} : vector<16x32xf32>, vector<32x32xf32>, vector<16x32xf32> -> vector<16x32xf32>
    %c11 = arith.constant 11 : index
    %c0_110 = arith.constant 0 : index
    %251 = vector.load %arg3[%c11, %c0_110] : memref<18x96xf32, #tpu.memory_space<vmem>>, vector<1x32xf32>
    %252 = vector.broadcast %251 : vector<1x32xf32> to vector<16x32xf32>
    %253 = arith.addf %250, %252 : vector<16x32xf32>
    %254 = arith.addf %149, %253 : vector<16x32xf32>
    %c12 = arith.constant 12 : index
    %c0_111 = arith.constant 0 : index
    %255 = vector.load %arg3[%c12, %c0_111] : memref<18x96xf32, #tpu.memory_space<vmem>>, vector<1x32xf32>
    %c13 = arith.constant 13 : index
    %c0_112 = arith.constant 0 : index
    %256 = vector.load %arg3[%c13, %c0_112] : memref<18x96xf32, #tpu.memory_space<vmem>>, vector<1x32xf32>
    %cst_113 = arith.constant dense<0.000000e+00> : vector<16xf32>
    %257 = vector.multi_reduction <add>, %254, %cst_113 [1] : vector<16x32xf32> to vector<16xf32>
    %258 = vector.shape_cast %257 : vector<16xf32> to vector<16x1xf32>
    %cst_114 = arith.constant 3.200000e+01 : f32
    %259 = vector.broadcast %cst_114 : f32 to vector<16x1xf32>
    %260 = arith.divf %258, %259 : vector<16x1xf32>
    %261 = vector.broadcast %260 : vector<16x1xf32> to vector<16x32xf32>
    %262 = arith.subf %254, %261 : vector<16x32xf32>
    %263 = arith.mulf %262, %262 : vector<16x32xf32>
    %cst_115 = arith.constant dense<0.000000e+00> : vector<16xf32>
    %264 = vector.multi_reduction <add>, %263, %cst_115 [1] : vector<16x32xf32> to vector<16xf32>
    %265 = vector.shape_cast %264 : vector<16xf32> to vector<16x1xf32>
    %cst_116 = arith.constant 0.0322580636 : f32
    %266 = vector.broadcast %cst_116 : f32 to vector<16x1xf32>
    %267 = arith.mulf %265, %266 : vector<16x1xf32>
    %268 = math.sqrt %267 : vector<16x1xf32>
    %cst_117 = arith.constant 9.99999997E-7 : f32
    %269 = vector.broadcast %cst_117 : f32 to vector<16x1xf32>
    %270 = arith.addf %268, %269 : vector<16x1xf32>
    %271 = vector.broadcast %270 : vector<16x1xf32> to vector<16x32xf32>
    %272 = arith.divf %262, %271 : vector<16x32xf32>
    %273 = vector.broadcast %255 : vector<1x32xf32> to vector<16x32xf32>
    %274 = arith.mulf %273, %272 : vector<16x32xf32>
    %275 = vector.broadcast %256 : vector<1x32xf32> to vector<16x32xf32>
    %276 = arith.addf %274, %275 : vector<16x32xf32>
    %c1_118 = arith.constant 1 : index
    %c0_119 = arith.constant 0 : index
    %c256_120 = arith.constant 256 : index
    %277 = vector.load %arg4[%c1_118, %c0_119, %c256_120] : memref<2x32x384xf32, #tpu.memory_space<vmem>>, vector<1x32x64xf32>
    %278 = vector.shape_cast %277 : vector<1x32x64xf32> to vector<32x64xf32>
    %cst_121 = arith.constant dense<0.000000e+00> : vector<16x64xf32>
    %279 = tpu.matmul %276, %278, %cst_121 {dimension_numbers = #tpu.dot_dimension_numbers<[1], [0], [0], [1], [0, 0, 1, 1], [], []>} : vector<16x32xf32>, vector<32x64xf32>, vector<16x64xf32> -> vector<16x64xf32>
    %c14 = arith.constant 14 : index
    %c0_122 = arith.constant 0 : index
    %280 = vector.load %arg3[%c14, %c0_122] : memref<18x96xf32, #tpu.memory_space<vmem>>, vector<1x64xf32>
    %281 = vector.broadcast %280 : vector<1x64xf32> to vector<16x64xf32>
    %282 = arith.addf %279, %281 : vector<16x64xf32>
    %cst_123 = arith.constant 0.000000e+00 : f32
    %283 = vector.broadcast %cst_123 : f32 to vector<16x64xf32>
    %284 = arith.maximumf %282, %283 : vector<16x64xf32>
    %c1_124 = arith.constant 1 : index
    %c0_125 = arith.constant 0 : index
    %c0_126 = arith.constant 0 : index
    %285 = vector.load %arg5[%c1_124, %c0_125, %c0_126] : memref<2x64x32xf32, #tpu.memory_space<vmem>>, vector<1x64x32xf32>
    %286 = vector.shape_cast %285 : vector<1x64x32xf32> to vector<64x32xf32>
    %cst_127 = arith.constant dense<0.000000e+00> : vector<16x32xf32>
    %287 = tpu.matmul %284, %286, %cst_127 {dimension_numbers = #tpu.dot_dimension_numbers<[1], [0], [0], [1], [0, 0, 1, 1], [], []>} : vector<16x64xf32>, vector<64x32xf32>, vector<16x32xf32> -> vector<16x32xf32>
    %c15 = arith.constant 15 : index
    %c0_128 = arith.constant 0 : index
    %288 = vector.load %arg3[%c15, %c0_128] : memref<18x96xf32, #tpu.memory_space<vmem>>, vector<1x32xf32>
    %289 = vector.broadcast %288 : vector<1x32xf32> to vector<16x32xf32>
    %290 = arith.addf %287, %289 : vector<16x32xf32>
    %291 = arith.addf %254, %290 : vector<16x32xf32>
    %c16_129 = arith.constant 16 : index
    %c0_130 = arith.constant 0 : index
    %292 = vector.load %arg3[%c16_129, %c0_130] : memref<18x96xf32, #tpu.memory_space<vmem>>, vector<1x32xf32>
    %c17 = arith.constant 17 : index
    %c0_131 = arith.constant 0 : index
    %293 = vector.load %arg3[%c17, %c0_131] : memref<18x96xf32, #tpu.memory_space<vmem>>, vector<1x32xf32>
    %cst_132 = arith.constant dense<0.000000e+00> : vector<16xf32>
    %294 = vector.multi_reduction <add>, %291, %cst_132 [1] : vector<16x32xf32> to vector<16xf32>
    %295 = vector.shape_cast %294 : vector<16xf32> to vector<16x1xf32>
    %cst_133 = arith.constant 3.200000e+01 : f32
    %296 = vector.broadcast %cst_133 : f32 to vector<16x1xf32>
    %297 = arith.divf %295, %296 : vector<16x1xf32>
    %298 = vector.broadcast %297 : vector<16x1xf32> to vector<16x32xf32>
    %299 = arith.subf %291, %298 : vector<16x32xf32>
    %300 = arith.mulf %299, %299 : vector<16x32xf32>
    %cst_134 = arith.constant dense<0.000000e+00> : vector<16xf32>
    %301 = vector.multi_reduction <add>, %300, %cst_134 [1] : vector<16x32xf32> to vector<16xf32>
    %302 = vector.shape_cast %301 : vector<16xf32> to vector<16x1xf32>
    %cst_135 = arith.constant 0.0322580636 : f32
    %303 = vector.broadcast %cst_135 : f32 to vector<16x1xf32>
    %304 = arith.mulf %302, %303 : vector<16x1xf32>
    %305 = math.sqrt %304 : vector<16x1xf32>
    %cst_136 = arith.constant 9.99999997E-7 : f32
    %306 = vector.broadcast %cst_136 : f32 to vector<16x1xf32>
    %307 = arith.addf %305, %306 : vector<16x1xf32>
    %308 = vector.broadcast %307 : vector<16x1xf32> to vector<16x32xf32>
    %309 = arith.divf %299, %308 : vector<16x32xf32>
    %310 = vector.broadcast %292 : vector<1x32xf32> to vector<16x32xf32>
    %311 = arith.mulf %310, %309 : vector<16x32xf32>
    %312 = vector.broadcast %293 : vector<1x32xf32> to vector<16x32xf32>
    %313 = arith.addf %311, %312 : vector<16x32xf32>
    %c0_137 = arith.constant 0 : index
    %c0_138 = arith.constant 0 : index
    %c0_139 = arith.constant 0 : index
    %314 = vector.load %arg6[%c0_137, %c0_138, %c0_139] : memref<1x16x32xf32, #tpu.memory_space<vmem>>, vector<1x16x32xf32>
    %315 = vector.shape_cast %314 : vector<1x16x32xf32> to vector<16x32xf32>
    %316 = vector.shape_cast %313 : vector<16x32xf32> to vector<1x16x32xf32>
    tpu.vector_store %arg6[%c0_137, %c0_138, %c0_139], %316 {strides = array<i32>} : memref<1x16x32xf32, #tpu.memory_space<vmem>>, vector<1x16x32xf32>,
    return
  }
  func.func @transform_0(%arg0: i32) -> (i32, i32, i32) {
    %c0_i32 = arith.constant 0 : i32
    %c0_i32_0 = arith.constant 0 : i32
    %c0_i32_1 = arith.constant 0 : i32
    return %arg0, %c0_i32, %c0_i32_0 : i32, i32, i32
  }
  func.func @transform_1(%arg0: i32) -> (i32, i32, i32) {
    %c0_i32 = arith.constant 0 : i32
    %c0_i32_0 = arith.constant 0 : i32
    %c0_i32_1 = arith.constant 0 : i32
    return %arg0, %c0_i32, %c0_i32_0 : i32, i32, i32
  }
  func.func @transform_2(%arg0: i32) -> (i32, i32) {
    %c0_i32 = arith.constant 0 : i32
    %c0_i32_0 = arith.constant 0 : i32
    %c0_i32_1 = arith.constant 0 : i32
    return %c0_i32, %c0_i32_0 : i32, i32
  }
  func.func @transform_3(%arg0: i32) -> (i32, i32, i32) {
    %c0_i32 = arith.constant 0 : i32
    %c0_i32_0 = arith.constant 0 : i32
    %c0_i32_1 = arith.constant 0 : i32
    %c0_i32_2 = arith.constant 0 : i32
    return %c0_i32, %c0_i32_0, %c0_i32_1 : i32, i32, i32
  }
  func.func @transform_4(%arg0: i32) -> (i32, i32, i32) {
    %c0_i32 = arith.constant 0 : i32
    %c0_i32_0 = arith.constant 0 : i32
    %c0_i32_1 = arith.constant 0 : i32
    %c0_i32_2 = arith.constant 0 : i32
    return %c0_i32, %c0_i32_0, %c0_i32_1 : i32, i32, i32
  }
  func.func @transform_5(%arg0: i32) -> (i32, i32, i32) {
    %c0_i32 = arith.constant 0 : i32
    %c0_i32_0 = arith.constant 0 : i32
    %c0_i32_1 = arith.constant 0 : i32
    return %arg0, %c0_i32, %c0_i32_0 : i32, i32, i32
  }
}

</mosaic_0001>

<bundles_post_ra>
// kernel: tpu_custom_call.1
= control target key start
LH: loop header
LB: loop body
LE: loop exit
PB: predicated region body
PF: predicated region fallthrough
CT: control target
= control target key end

     0   :  { %10 = vsyncpa [#allocation4], 0  ;;  %s4021_s0 = inlined_call_operand.hbm [shape: f32[1,16,32], index: 0, kind: input, shape index: {}]   ;;  %s4022_s1 = inlined_call_operand.hbm [shape: f32[2,16,16], index: 1, kind: input, shape index: {}]   ;;  %s4023_s2 = inlined_call_operand.hbm [shape: f32[18,96], index: 2, kind: input, shape index: {}]   ;;  %s4024_s3 = inlined_call_operand.vmem [shape: f32[2,32,384], index: 3, kind: input, shape index: {}]   ;;  %s4025_s4 = inlined_call_operand.vmem [shape: f32[2,64,32], index: 4, kind: input, shape index: {}]   ;;  %s4026_s5 = inlined_call_operand.hbm [shape: f32[1,16,32], index: 5, kind: output, shape index: {}]  }
   0x1   :  { %11 = vsyncpa [#allocation7], 0 }
   0x2   :  { %12 = vsyncpa [#allocation5], 0  ;;  %s3448_s18 = smov [#allocation6]   ;;  %s3449_s20 = smov [#allocation3]  }
   0x3   :  { %s30_s19 = sshll.u32 %s3448_s18, 4  ;;  %s18_s21 = sshll.u32 %s3449_s20, 4  ;;  %s31_s19 = int_to_ptr.vmem [resolvable:$true] %s30_s19  ;;  %s19_s21 = int_to_ptr.vmem [resolvable:$true] %s18_s21 }
   0x4   :  { %s3370_s22 = scalar_lea.vmem %s31_s19, 512  ;;  %p3375_p1 = scmp.lt.s32.totalorder %s31_s19, %s31_s19 }
   0x5   :  { %p3371_p0 = scmp.ne.s32.totalorder %s31_s19, %s3370_s22  ;;  %p3376_p2 = scmp.lt.s32.totalorder %s3370_s22, %s3370_s22 }
   0x7   :  { %p3377_p3 = por %p3376_p2, %p3375_p1 }
   0x9   :  { %p3378_p4 = pnand %p3377_p3, %p3371_p0 }
   0xb   :  { %3381 = shalt.err (!%p3378_p4)
}
   0xc   :  { %s3450_s23 = smov 128   ;;  %s3451_s24 = smov 8  }
   0xd   :  { %36 = dma.hbm_to_vmem [thread:$0]  %s4022_s1, 512, %s31_s19, [#allocation7], %s3450_s23, %s3450_s23, %s3451_s24  }
   0xe   :  { %s3390_s27 = scalar_lea.vmem %s19_s21, 256  ;;  %p3395_p6 = scmp.lt.s32.totalorder %s19_s21, %s19_s21 }
   0xf   :  { %p3391_p5 = scmp.ne.s32.totalorder %s19_s21, %s3390_s27  ;;  %p3396_p7 = scmp.lt.s32.totalorder %s3390_s27, %s3390_s27 }
  0x11   :  { %p3397_p8 = por %p3396_p7, %p3395_p6 }
  0x13   :  { %p3398_p9 = pnand %p3397_p8, %p3391_p5 }
  0x15   :  { %3401 = shalt.err (!%p3398_p9)
}
  0x16   :  { %24 = dma.hbm_to_vmem [thread:$0]  %s4021_s0, 256, %s19_s21, [#allocation4], %s3450_s23, %s3450_s23, %s3451_s24  }
  0x17   :  { %s3452_s30 = smov [#allocation8]  }
  0x18   :  { %s42_s6 = sshll.u32 %s3452_s30, 4  ;;  %s43_s6 = int_to_ptr.vmem [resolvable:$true] %s42_s6 }
  0x19   :  { %s3410_s7 = scalar_lea.vmem %s43_s6, 384  ;;  %p3415_p11 = scmp.lt.s32.totalorder %s43_s6, %s43_s6 }
  0x1a   :  { %p3411_p10 = scmp.ne.s32.totalorder %s43_s6, %s3410_s7  ;;  %p3416_p12 = scmp.lt.s32.totalorder %s3410_s7, %s3410_s7 }
  0x1c   :  { %p3417_p13 = por %p3416_p12, %p3415_p11 }
  0x1e   :  { %p3418_p0 = pnand %p3417_p13, %p3411_p10 }
  0x20   :  { %3421 = shalt.err (!%p3418_p0)
}
  0x21   :  { %48 = dma.hbm_to_vmem [thread:$0]  %s4023_s2, 384, %s43_s6, [#allocation7], %s3450_s23, %s3450_s23, %s3451_s24  }
  0x22   :  { %3442 = dma.done.wait [#allocation4], 256  }
  0x23   :  { %3443 = vsyncadd [#allocation4], 4294967040 }
  0x24   :  { %3444 = dma.done.wait [#allocation7], 896  }
  0x25   :  { %3445 = vsyncadd [#allocation7], 4294966400  ;;  %vm73_vm0 = vcmask 261120   ;;  %v3515_v0 = vld [vmem:[#allocation3] sm:$0xff]  ;;  %v3517_v1 = vld [vmem:[#allocation3 + $0x8] sm:$0xff]  ;;  %s3453_s15 = smov 96  }
  0x26   :  { %v74_v2 = vsel %vm73_vm0, %v3515_v0, 0.0  ;;  %v77_v3 = vsel %vm73_vm0, %v3517_v1, 0.0  ;;  %v130_v14 = vld [vmem:[%s4024_s3 + $0x48] sm:$0xff]  ;;  %v129_v15 = vld [vmem:[%s4024_s3 + $0x30] sm:$0xff]  ;;  %v128_v16 = vld [vmem:[%s4024_s3 + $0x18] sm:$0xff]  ;;  %vm225_vm5 = vcmask 64512  }
  0x27   :  { %75 = vadd.xlane.f32.xlu0 %v74_v2  ;;  %3021 = vmatprep.subr.mxu1 %v130_v14  ;;  %v127_v17 = vld [vmem:[%s4024_s3] sm:$0xff]  ;;  %s3454_s16 = smov 120   ;;  %s3455_s17 = smov 88   ;;  %v3577_v57 = vld [vmem:[#allocation6 + $0x8] sm:$0xff]  ;;  %v3582_v59 = vld [vmem:[#allocation6 + $0x18] sm:$0xff]  ;;  %vm313_vm7 = vcmask 130048  }
  0x28   :  { %3022 = vmatpush3.msra.mxu1 %v130_v14  ;;  %v2799_v35 = vld [vmem:[#allocation8] ss:$0 sm:$0xff]  ;;  %v2800_v37 = vld [vmem:[#allocation8 + $0x1] ss:$0 sm:$0xff]  ;;  %v2801_v44 = vld [vmem:[#allocation8 + $0x2] ss:$0 sm:$0xff] }
  0x29   :  { %3023 = vmatprep.subr.mxu1 %v129_v15  ;;  %v3579_v58 = vld [vmem:[#allocation6] sm:$0xff]  ;;  %vm67_vm6 = vcmp.ne.f32.partialorder %v3577_v57, 0.0  ;;  %v3585_v61 = vld [vmem:[#allocation6 + $0x10] sm:$0xff]  ;;  %s3456_s18 = smov 64   ;;  %s3457_s19 = smov 56   ;;  %vm635_vm9 = vcmask 130112  }
  0x2a   :  { %3024 = vmatpush3.msra.mxu1 %v129_v15  ;;  %vm66_vm8 = vcmp.ne.f32.partialorder %v3579_v58, 0.0  ;;  %s3458_s20 = smov 80   ;;  %s3459_s21 = smov 112   ;;  %vm848_vm10 = vcmask 195712   ;;  %vm1061_vm11 = vcmask 261312  }
  0x2b   :  { %78 = vadd.xlane.f32.xlu0 %v77_v3  ;;  %3025 = vmatprep.subr.mxu1 %v128_v16  ;;  %s3460_s22 = smov 48   ;;  %s3461_s25 = smov 72  }
  0x2c   :  { %3026 = vmatpush3.msra.mxu1 %v128_v16  ;;  %s3462_s26 = smov 104   ;;  %s3463_s27 = smov 40  }
  0x2d   :  { %3027 = vmatprep.subr.mxu1 %v127_v17  ;;  %s3464_s28 = smov 16   ;;  %s3465_s9 = smov 24  }
  0x2e   :  { %3028 = vmatpush3.msra.mxu1 %v127_v17 }
  0xb0   :  { %v76_v4 = vpop.xlane.xlu0 %75 }
  0xb1   :  { %v81_v5 = vmul.f32 0.03125, %v76_v4 }
  0xb3   :  { %v83_v6 = vsub.f32 %v3515_v0, %v81_v5 }
  0xb4   :  { %v79_v7 = vpop.xlane.xlu0 %78 }
  0xb5   :  { %v82_v8 = vmul.f32 0.03125, %v79_v7  ;;  %v85_v9 = vmul.f32 %v83_v6, %v83_v6 }
  0xb7   :  { %v84_v10 = vsub.f32 %v3517_v1, %v82_v8  ;;  %v87_v11 = vsel %vm73_vm0, %v85_v9, 0.0 }
  0xb8   :  { %88 = vadd.xlane.f32.xlu1 %v87_v11 }
  0xb9   :  { %v86_v12 = vmul.f32 %v84_v10, %v84_v10 }
  0xbb   :  { %v90_v13 = vsel %vm73_vm0, %v86_v12, 0.0 }
  0xbc   :  { %91 = vadd.xlane.f32.xlu1 %v90_v13 }
 0x141   :  { %v89_v18 = vpop.xlane.xlu1 %88 }
 0x142   :  { %v93_v19 = vmul.f32 0.032258064, %v89_v18 }
 0x144   :  { %3256 = vrsqrt.f32 %v93_v19  ;;  %vm97_vm1 = vcmp.eq.f32.partialorder %v93_v19, inf  ;;  %v100_v24 = vand.u32 2147483648, %v93_v19  ;;  %vm99_vm2 = vcmp.eq.f32.partialorder %v93_v19, 0.0 }
 0x145   :  { %v92_v20 = vpop.xlane.xlu1 %91 }
 0x146   :  { %v94_v21 = vmul.f32 0.032258064, %v92_v20 }
 0x148   :  { %3258 = vrsqrt.f32 %v94_v21  ;;  %vm104_vm3 = vcmp.eq.f32.partialorder %v94_v21, inf  ;;  %v107_v30 = vand.u32 2147483648, %v94_v21  ;;  %vm106_vm4 = vcmp.eq.f32.partialorder %v94_v21, 0.0 }
 0x151   :  { %v3257_v22 = vpop.eup %3256 }
 0x152   :  { %v96_v23 = vmul.f32 %v3257_v22, %v93_v19 }
 0x154   :  { %v98_v25 = vsel %vm97_vm1, %v93_v19, %v96_v23  ;;  %vm1317_vm1 = vcmask 523264  }
 0x155   :  { %v3259_v26 = vpop.eup %3258  ;;  %v101_v27 = vsel %vm99_vm2, %v100_v24, %v98_v25 }
 0x156   :  { %v103_v28 = vmul.f32 %v3259_v26, %v94_v21  ;;  %v109_v29 = vadd.f32 1e-06, %v101_v27 }
 0x158   :  { %v105_v31 = vsel %vm104_vm3, %v94_v21, %v103_v28  ;;  %3260 = vrcp.f32 %v109_v29 }
 0x159   :  { %v108_v32 = vsel %vm106_vm4, %v107_v30, %v105_v31 }
 0x15a   :  { %v110_v33 = vadd.f32 1e-06, %v108_v32 }
 0x15c   :  { %3262 = vrcp.f32 %v110_v33 }
 0x165   :  { %v3261_v34 = vpop.eup %3260 }
 0x166   :  { %v112_v36 = vmul.f32 %v3261_v34, %v83_v6 }
 0x168   :  { %v119_v38 = vmul.f32 %v2799_v35, %v112_v36 }
 0x169   :  { %v3263_v39 = vpop.eup %3262 }
 0x16a   :  { %v114_v40 = vmul.f32 %v3263_v39, %v84_v10  ;;  %v125_v41 = vadd.f32 %v2800_v37, %v119_v38 }
 0x16c   :  { %v120_v42 = vmul.f32 %v2799_v35, %v114_v40  ;;  %3029 = vmatprep.mubr.msk.f32.mxu1 %vm73_vm0, %v125_v41 }
 0x16e   :  { %v126_v43 = vadd.f32 %v2800_v37, %v120_v42 }
 0x170   :  { %3030 = vmatmul.mubr.msk.f32.vlgmr.msra.gmra.mxu1 %vm73_vm0, %v126_v43 }
 0x230   :  { %v3031_v45 = vpop.f32.mrf.mxu1 }
 0x231   :  { %v3541_v46 = vadd.f32 %v3031_v45, %v2801_v44 }
 0x232   :  { %v208_v47 = vpop.f32.mrf.mxu1 }
 0x233   :  { %v3543_v48 = vadd.f32 %v2801_v44, %v208_v47  ;;  %223 = vrot.lane.b32.xlu0 %v3541_v46, %s3453_s15  ;;  %v3561_v50 = vmul.f32 0.35355338, %v3541_v46 }
 0x235   :  { %221 = vrot.lane.b32.xlu1 %v3543_v48, %s3453_s15  ;;  %v3550_v49 = vmul.f32 0.35355338, %v3543_v48 }
 0x237   :  { %425 = vrot.lane.b32.xlu0 %v3550_v49, %s3454_s16  ;;  %3036 = vmatprep.mubr.msk.f32.mxu1 %vm225_vm5, %v3550_v49 }
 0x239   :  { %431 = vrot.lane.b32.xlu1 %v3541_v46, %s3455_s17 }
 0x23d   :  { %429 = vrot.lane.b32.xlu1 %v3543_v48, %s3455_s17 }
 0x241   :  { %427 = vrot.lane.b32.xlu1 %v3561_v50, %s3454_s16 }
 0x2a5   :  { %v224_v51 = vpop.permute.xlu0 %223 }
 0x2a6   :  { %3032 = vmatprep.subr.msk.mxu1 %vm225_vm5, %v224_v51 }
 0x2a7   :  { %3033 = vmatpush3.xpose.msk.msra.mxu1 %vm225_vm5, %v224_v51  ;;  %v222_v52 = vpop.permute.xlu1 %221 }
 0x2a8   :  { %3034 = vmatprep.subr.msk.mxu1 %vm225_vm5, %v222_v52 }
 0x2a9   :  { %v426_v54 = vpop.permute.xlu0 %425 }
 0x2ab   :  { %3035 = vmatpush3.xpose.msk.msra.mxu1 %vm225_vm5, %v222_v52  ;;  %v432_v53 = vpop.permute.xlu1 %431 }
 0x2ac   :  { %3046 = vmatprep.subr.msk.mxu1 %vm225_vm5, %v432_v53 }
 0x2ae   :  { %3037 = vmatmul.mubr.msk.f32.vlgmr.msra.gmra.mxu1 %vm225_vm5, %v3561_v50 }
 0x2af   :  { %v430_v55 = vpop.permute.xlu1 %429  ;;  %3047 = vmatpush3.xpose.msk.msra.mxu1 %vm225_vm5, %v432_v53  ;;  %3050 = vmatprep.mubr.msk.f32.mxu1 %vm225_vm5, %v426_v54 }
 0x2b0   :  { %3048 = vmatprep.subr.msk.mxu1 %vm225_vm5, %v430_v55 }
 0x2b3   :  { %3049 = vmatpush3.xpose.msk.msra.mxu1 %vm225_vm5, %v430_v55  ;;  %v428_v56 = vpop.permute.xlu1 %427 }
 0x2b6   :  { %3051 = vmatmul.mubr.msk.f32.vlgmr.msra.gmra.mxu1 %vm225_vm5, %v428_v56 }
 0x36e   :  { %v3038_v60 = vpop.f32.mrf.mxu1 }
 0x36f   :  { %v312_v62 = vsel %vm67_vm6, %v3582_v59, %v3038_v60 }
 0x370   :  { %v302_v63 = vpop.f32.mrf.mxu1  ;;  %v317_v2 = vsel %vm313_vm7, %v312_v62, -inf }
 0x371   :  { %318 = vmax.xlane.f32.xlu1 %v317_v2  ;;  %v311_v3 = vsel %vm66_vm8, %v3585_v61, %v302_v63 }
 0x372   :  { %v314_v4 = vsel %vm313_vm7, %v311_v3, -inf }
 0x373   :  { %315 = vmax.xlane.f32.xlu0 %v314_v4 }
 0x376   :  { %v3052_v5 = vpop.f32.mrf.mxu1 }
 0x377   :  { %v517_v9 = vsel %vm67_vm6, %v3582_v59, %v3052_v5 }
 0x378   :  { %v507_v6 = vpop.f32.mrf.mxu1  ;;  %v521_v10 = vsel %vm313_vm7, %v517_v9, -inf }
 0x379   :  { %v516_v7 = vsel %vm66_vm8, %v3585_v61, %v507_v6 }
 0x37a   :  { %v518_v8 = vsel %vm313_vm7, %v516_v7, -inf }
 0x37b   :  { %519 = vmax.xlane.f32.xlu0 %v518_v8 }
 0x37f   :  { %522 = vmax.xlane.f32.xlu0 %v521_v10 }
 0x382   :  { %336 = vrot.lane.b32.xlu1 %v3543_v48, %s3456_s18 }
 0x386   :  { %542 = vrot.lane.b32.xlu1 %v3541_v46, %s3457_s19 }
 0x38a   :  { %540 = vrot.lane.b32.xlu1 %v3543_v48, %s3457_s19 }
 0x395   :  { %338 = vrot.lane.b32.xlu0 %v3541_v46, %s3456_s18 }
 0x3fa   :  { %v319_v11 = vpop.xlane.xlu1 %318 }
 0x3fb   :  { %v321_v12 = vsub.f32 %v312_v62, %v319_v11 }
 0x3fc   :  { %v316_v13 = vpop.xlane.xlu0 %315 }
 0x3fd   :  { %v324_v14 = vmul.f32 1.442695, %v321_v12  ;;  %v320_v15 = vsub.f32 %v311_v3, %v316_v13 }
 0x3fe   :  { %v337_v22 = vpop.permute.xlu1 %336 }
 0x3ff   :  { %3264 = vpow2.f32 %v324_v14  ;;  %v322_v16 = vmul.f32 1.442695, %v320_v15 }
 0x401   :  { %3266 = vpow2.f32 %v322_v16 }
 0x402   :  { %v543_v29 = vpop.permute.xlu1 %542 }
 0x404   :  { %v520_v17 = vpop.xlane.xlu0 %519 }
 0x405   :  { %v524_v18 = vsub.f32 %v516_v7, %v520_v17 }
 0x406   :  { %v541_v34 = vpop.permute.xlu1 %540 }
 0x407   :  { %v526_v19 = vmul.f32 1.442695, %v524_v18 }
 0x408   :  { %v523_v20 = vpop.xlane.xlu0 %522 }
 0x409   :  { %3268 = vpow2.f32 %v526_v19  ;;  %v525_v21 = vsub.f32 %v517_v9, %v523_v20 }
 0x40b   :  { %v528_v23 = vmul.f32 1.442695, %v525_v21 }
 0x40c   :  { %v3265_v24 = vpop.eup %3264  ;;  %v339_v25 = vpop.permute.xlu0 %338 }
 0x40d   :  { %3270 = vpow2.f32 %v528_v23  ;;  %3039 = vmatprep.subr.mxu0 %v339_v25  ;;  %v329_v26 = vsel %vm313_vm7, %v3265_v24, 0.0 }
 0x40e   :  { %v3267_v27 = vpop.eup %3266  ;;  %330 = vadd.xlane.f32.xlu1 %v329_v26  ;;  %3040 = vmatpush3.msra.mxu0 %v339_v25 }
 0x40f   :  { %3041 = vmatprep.subr.mxu0 %v337_v22  ;;  %v326_v28 = vsel %vm313_vm7, %v3267_v27, 0.0 }
 0x410   :  { %327 = vadd.xlane.f32.xlu0 %v326_v28  ;;  %3042 = vmatpush3.msra.mxu0 %v337_v22 }
 0x411   :  { %3053 = vmatprep.subr.mxu0 %v543_v29 }
 0x416   :  { %v3269_v30 = vpop.eup %3268 }
 0x417   :  { %v530_v31 = vsel %vm313_vm7, %v3269_v30, 0.0 }
 0x418   :  { %531 = vadd.xlane.f32.xlu0 %v530_v31 }
 0x41a   :  { %v3271_v32 = vpop.eup %3270 }
 0x41b   :  { %v533_v33 = vsel %vm313_vm7, %v3271_v32, 0.0 }
 0x41c   :  { %534 = vadd.xlane.f32.xlu1 %v533_v33 }
 0x42d   :  { %642 = vrot.lane.b32.xlu1 %v3543_v48, %s3458_s20 }
 0x42e   :  { %644 = vrot.lane.b32.xlu0 %v3541_v46, %s3458_s20 }
 0x431   :  { %640 = vrot.lane.b32.xlu1 %v3561_v50, %s3459_s21 }
 0x432   :  { %638 = vrot.lane.b32.xlu0 %v3550_v49, %s3459_s21 }
 0x497   :  { %v331_v35 = vpop.xlane.xlu1 %330 }
 0x498   :  { %3272 = vrcp.f32 %v331_v35 }
 0x499   :  { %v328_v36 = vpop.xlane.xlu0 %327 }
 0x49a   :  { %3274 = vrcp.f32 %v328_v36 }
 0x4a1   :  { %v532_v37 = vpop.xlane.xlu0 %531 }
 0x4a2   :  { %3276 = vrcp.f32 %v532_v37 }
 0x4a5   :  { %v535_v38 = vpop.xlane.xlu1 %534  ;;  %v3273_v39 = vpop.eup %3272 }
 0x4a6   :  { %3278 = vrcp.f32 %v535_v38  ;;  %v335_v42 = vmul.f32 %v3273_v39, %v3265_v24  ;;  %v645_v43 = vpop.permute.xlu0 %644 }
 0x4a7   :  { %v3275_v40 = vpop.eup %3274 }
 0x4a8   :  { %v333_v41 = vmul.f32 %v3275_v40, %v3267_v27 }
 0x4a9   :  { %v643_v53 = vpop.permute.xlu1 %642 }
 0x4aa   :  { %3043 = vmatprep.mubr.msk.f32.mxu0 %vm313_vm7, %v333_v41  ;;  %v639_v52 = vpop.permute.xlu0 %638 }
 0x4ab   :  { %3044 = vmatmul.mubr.msk.f32.vlgmr.msra.gmra.mxu0 %vm313_vm7, %v335_v42 }
 0x4ac   :  { %3054 = vmatpush3.msra.mxu0 %v543_v29 }
 0x4ad   :  { %3055 = vmatprep.subr.mxu0 %v541_v34  ;;  %v641_v54 = vpop.permute.xlu1 %640 }
 0x4ae   :  { %3056 = vmatpush3.msra.mxu0 %v541_v34 }
 0x4af   :  { %v3277_v44 = vpop.eup %3276  ;;  %3060 = vmatprep.subr.msk.mxu0 %vm225_vm5, %v645_v43 }
 0x4b0   :  { %v537_v45 = vmul.f32 %v3277_v44, %v3269_v30 }
 0x4b2   :  { %3057 = vmatprep.mubr.msk.f32.mxu0 %vm313_vm7, %v537_v45 }
 0x4b3   :  { %v3279_v47 = vpop.eup %3278 }
 0x4b4   :  { %v539_v51 = vmul.f32 %v3279_v47, %v3271_v32 }
 0x4b6   :  { %3058 = vmatmul.mubr.msk.f32.vlgmr.msra.gmra.mxu0 %vm313_vm7, %v539_v51 }
 0x4b7   :  { %3061 = vmatpush3.xpose.msk.msra.mxu0 %vm225_vm5, %v645_v43  ;;  %3064 = vmatprep.mubr.msk.f32.mxu0 %vm225_vm5, %v639_v52 }
 0x4b8   :  { %3062 = vmatprep.subr.msk.mxu0 %vm225_vm5, %v643_v53 }
 0x4bb   :  { %3063 = vmatpush3.xpose.msk.msra.mxu0 %vm225_vm5, %v643_v53 }
 0x4be   :  { %3065 = vmatmul.mubr.msk.f32.vlgmr.msra.gmra.mxu0 %vm225_vm5, %v641_v54 }
 0x56b   :  { %v3045_v55 = vpop.f32.mrf.mxu0 }
 0x56c   :  { %424 = vst.msk [vmem:[#allocation2 + $0x8] sm:$0xff] %vm225_vm5, %v3045_v55 }
 0x56d   :  { %v414_v56 = vpop.f32.mrf.mxu0 }
 0x56e   :  { %423 = vst.msk [vmem:[#allocation2] sm:$0xff] %vm225_vm5, %v414_v56 }
 0x576   :  { %v3635_v60 = vpop.f32.mrf.mxu0 }
 0x578   :  { %v3637_v62 = vpop.f32.mrf.mxu0 }
 0x57e   :  { %v3066_v63 = vpop.f32.mrf.mxu0 }
 0x57f   :  { %v730_v2 = vsel %vm67_vm6, %v3582_v59, %v3066_v63 }
 0x580   :  { %v720_v3 = vpop.f32.mrf.mxu0  ;;  %v734_v4 = vsel %vm313_vm7, %v730_v2, -inf }
 0x581   :  { %735 = vmax.xlane.f32.xlu1 %v734_v4  ;;  %v729_v5 = vsel %vm66_vm8, %v3585_v61, %v720_v3  ;;  %v1067_v3 = vld [vmem:[%s4024_s3 + $0x20] sm:$0xff]  ;;  %v1066_v4 = vld [vmem:[%s4024_s3 + $0x8] sm:$0xff] }
 0x582   :  { %v731_v6 = vsel %vm313_vm7, %v729_v5, -inf }
 0x583   :  { %732 = vmax.xlane.f32.xlu0 %v731_v6 }
 0x592   :  { %753 = vrot.lane.b32.xlu1 %v3543_v48, %s3460_s22 }
 0x596   :  { %857 = vrot.lane.b32.xlu1 %v3541_v46, %s3461_s25 }
 0x59a   :  { %855 = vrot.lane.b32.xlu1 %v3543_v48, %s3461_s25 }
 0x59e   :  { %853 = vrot.lane.b32.xlu1 %v3561_v50, %s3462_s26 }
 0x60a   :  { %v736_v7 = vpop.xlane.xlu1 %735 }
 0x60b   :  { %v738_v8 = vsub.f32 %v730_v2, %v736_v7  ;;  %v1068_v2 = vld [vmem:[%s4024_s3 + $0x38] sm:$0xff] }
 0x60c   :  { %v733_v9 = vpop.xlane.xlu0 %732 }
 0x60d   :  { %v741_v10 = vmul.f32 1.442695, %v738_v8  ;;  %v737_v11 = vsub.f32 %v729_v5, %v733_v9 }
 0x60e   :  { %v754_v18 = vpop.permute.xlu1 %753 }
 0x60f   :  { %3280 = vpow2.f32 %v741_v10  ;;  %v739_v12 = vmul.f32 1.442695, %v737_v11  ;;  %v2828_v11 = vld [vmem:[#allocation8 + $0x3] ss:$0 sm:$0xff] }
 0x611   :  { %3282 = vpow2.f32 %v739_v12 }
 0x612   :  { %v858_v20 = vpop.permute.xlu1 %857 }
 0x616   :  { %v856_v25 = vpop.permute.xlu1 %855 }
 0x61a   :  { %v854_v26 = vpop.permute.xlu1 %853 }
 0x61c   :  { %v3281_v13 = vpop.eup %3280 }
 0x61d   :  { %v746_v14 = vsel %vm313_vm7, %v3281_v13, 0.0 }
 0x61e   :  { %v3283_v15 = vpop.eup %3282  ;;  %747 = vadd.xlane.f32.xlu0 %v746_v14 }
 0x61f   :  { %v743_v16 = vsel %vm313_vm7, %v3283_v15, 0.0 }
 0x622   :  { %744 = vadd.xlane.f32.xlu0 %v743_v16 }
 0x638   :  { %755 = vrot.lane.b32.xlu0 %v3541_v46, %s3460_s22 }
 0x63c   :  { %851 = vrot.lane.b32.xlu0 %v3550_v49, %s3462_s26 }
 0x6a7   :  { %v748_v50 = vpop.xlane.xlu0 %747 }
 0x6a8   :  { %3284 = vrcp.f32 %v748_v50 }
 0x6ab   :  { %v745_v17 = vpop.xlane.xlu0 %744 }
 0x6ac   :  { %3286 = vrcp.f32 %v745_v17 }
 0x6af   :  { %v756_v19 = vpop.permute.xlu0 %755 }
 0x6b0   :  { %3067 = vmatprep.subr.mxu1 %v756_v19 }
 0x6b1   :  { %3068 = vmatpush3.msra.mxu1 %v756_v19 }
 0x6b2   :  { %3069 = vmatprep.subr.mxu1 %v754_v18 }
 0x6b3   :  { %3070 = vmatpush3.msra.mxu1 %v754_v18  ;;  %v852_v49 = vpop.permute.xlu0 %851 }
 0x6b4   :  { %3074 = vmatprep.subr.msk.mxu1 %vm225_vm5, %v858_v20 }
 0x6b5   :  { %v3285_v21 = vpop.eup %3284 }
 0x6b6   :  { %v752_v24 = vmul.f32 %v3285_v21, %v3281_v13 }
 0x6b9   :  { %v3287_v22 = vpop.eup %3286 }
 0x6ba   :  { %v750_v23 = vmul.f32 %v3287_v22, %v3283_v15 }
 0x6bc   :  { %3071 = vmatprep.mubr.msk.f32.mxu1 %vm313_vm7, %v750_v23 }
 0x6bd   :  { %3072 = vmatmul.mubr.msk.f32.vlgmr.msra.gmra.mxu1 %vm313_vm7, %v752_v24 }
 0x6be   :  { %3075 = vmatpush3.xpose.msk.msra.mxu1 %vm225_vm5, %v858_v20  ;;  %3078 = vmatprep.mubr.msk.f32.mxu1 %vm225_vm5, %v852_v49 }
 0x6bf   :  { %3076 = vmatprep.subr.msk.mxu1 %vm225_vm5, %v856_v25 }
 0x6c2   :  { %3077 = vmatpush3.xpose.msk.msra.mxu1 %vm225_vm5, %v856_v25 }
 0x6c5   :  { %3079 = vmatmul.mubr.msk.f32.vlgmr.msra.gmra.mxu1 %vm225_vm5, %v854_v26  ;;  %v1215_v26 = vld [vmem:[%s4024_s3 + $0x58] sm:$0xff] }
 0x6c6   :  { %3099 = vmatprep.subr.mxu1 %v1215_v26 }
 0x6c7   :  { %3100 = vmatpush3.msra.mxu1 %v1215_v26 }
 0x77d   :  { %v3073_v27 = vpop.f32.mrf.mxu1 }
 0x77f   :  { %v831_v28 = vpop.f32.mrf.mxu1 }
 0x785   :  { %v3080_v29 = vpop.f32.mrf.mxu1 }
 0x786   :  { %v943_v30 = vsel %vm67_vm6, %v3582_v59, %v3080_v29  ;;  %v1212_v29 = vld [vmem:[%s4024_s3 + $0x10] sm:$0xff] }
 0x787   :  { %v933_v31 = vpop.f32.mrf.mxu1  ;;  %v947_v32 = vsel %vm313_vm7, %v943_v30, -inf }
 0x788   :  { %948 = vmax.xlane.f32.xlu1 %v947_v32  ;;  %v942_v33 = vsel %vm66_vm8, %v3585_v61, %v933_v31  ;;  %v1310_v31 = vld [vmem:[%s4025_s4 + $0x30] sm:$0xff]  ;;  %v1309_v32 = vld [vmem:[%s4025_s4 + $0x28] sm:$0xff] }
 0x789   :  { %v944_v34 = vsel %vm313_vm7, %v942_v33, -inf }
 0x78a   :  { %945 = vmax.xlane.f32.xlu0 %v944_v34 }
 0x799   :  { %966 = vrot.lane.b32.xlu1 %v3543_v48, %s3463_s27 }
 0x79d   :  { %629 = vrot.lane.b32.xlu1 %v3637_v62, %s3451_s24 }
 0x7a1   :  { %631 = vrot.lane.b32.xlu1 %v3635_v60, %s3451_s24 }
 0x7a5   :  { %844 = vrot.lane.b32.xlu1 %v3073_v27, %s3464_s28  ;;  %v1214_v27 = vld [vmem:[%s4024_s3 + $0x40] sm:$0xff] }
 0x7a6   :  { %3101 = vmatprep.subr.mxu1 %v1214_v27 }
 0x7a7   :  { %3102 = vmatpush3.msra.mxu1 %v1214_v27 }
 0x811   :  { %v949_v35 = vpop.xlane.xlu1 %948 }
 0x812   :  { %v951_v36 = vsub.f32 %v943_v30, %v949_v35  ;;  %v1311_v30 = vld [vmem:[%s4025_s4 + $0x38] sm:$0xff] }
 0x813   :  { %v946_v37 = vpop.xlane.xlu0 %945 }
 0x814   :  { %v954_v38 = vmul.f32 1.442695, %v951_v36  ;;  %v950_v39 = vsub.f32 %v942_v33, %v946_v37  ;;  %v1308_v33 = vld [vmem:[%s4025_s4 + $0x20] sm:$0xff] }
 0x815   :  { %v967_v40 = vpop.permute.xlu1 %966 }
 0x816   :  { %3288 = vpow2.f32 %v954_v38  ;;  %v952_v41 = vmul.f32 1.442695, %v950_v39 }
 0x818   :  { %3290 = vpow2.f32 %v952_v41 }
 0x819   :  { %v630_v48 = vpop.permute.xlu1 %629 }
 0x81a   :  { %636 = vst.msk [vmem:[#allocation2] sm:$0xff] %vm635_vm9, %v630_v48 }
 0x81d   :  { %v632_v42 = vpop.permute.xlu1 %631 }
 0x81e   :  { %637 = vst.msk [vmem:[#allocation2 + $0x8] sm:$0xff] %vm635_vm9, %v632_v42 }
 0x821   :  { %v845_v43 = vpop.permute.xlu1 %844 }
 0x822   :  { %850 = vst.msk [vmem:[#allocation2 + $0x8] sm:$0xff] %vm848_vm10, %v845_v43 }
 0x823   :  { %v3289_v44 = vpop.eup %3288 }
 0x824   :  { %v959_v45 = vsel %vm313_vm7, %v3289_v44, 0.0 }
 0x825   :  { %v3291_v47 = vpop.eup %3290  ;;  %960 = vadd.xlane.f32.xlu0 %v959_v45 }
 0x826   :  { %v956_v51 = vsel %vm313_vm7, %v3291_v47, 0.0 }
 0x829   :  { %957 = vadd.xlane.f32.xlu0 %v956_v51 }
 0x83f   :  { %968 = vrot.lane.b32.xlu0 %v3541_v46, %s3463_s27  ;;  %v1069_v46 = vld [vmem:[%s4024_s3 + $0x50] sm:$0xff] }
 0x843   :  { %842 = vrot.lane.b32.xlu0 %v831_v28, %s3464_s28  ;;  %v1213_v28 = vld [vmem:[%s4024_s3 + $0x28] sm:$0xff] }
 0x844   :  { %3103 = vmatprep.subr.mxu1 %v1213_v28 }
 0x845   :  { %3104 = vmatpush3.msra.mxu1 %v1213_v28 }
 0x846   :  { %3105 = vmatprep.subr.mxu1 %v1212_v29 }
 0x847   :  { %3106 = vmatpush3.msra.mxu1 %v1212_v29 }
 0x8ae   :  { %v961_v52 = vpop.xlane.xlu0 %960 }
 0x8af   :  { %3292 = vrcp.f32 %v961_v52 }
 0x8b2   :  { %v958_v53 = vpop.xlane.xlu0 %957 }
 0x8b3   :  { %3294 = vrcp.f32 %v958_v53 }
 0x8b6   :  { %v969_v54 = vpop.permute.xlu0 %968 }
 0x8b7   :  { %3081 = vmatprep.subr.mxu0 %v969_v54 }
 0x8b8   :  { %3082 = vmatpush3.msra.mxu0 %v969_v54  ;;  %v2831_v54 = vld [vmem:[#allocation8 + $0x4] ss:$0 sm:$0xff] }
 0x8b9   :  { %3083 = vmatprep.subr.mxu0 %v967_v40 }
 0x8ba   :  { %3084 = vmatpush3.msra.mxu0 %v967_v40  ;;  %v843_v55 = vpop.permute.xlu0 %842 }
 0x8bb   :  { %849 = vst.msk [vmem:[#allocation2] sm:$0xff] %vm848_vm10, %v843_v55  ;;  %3088 = vmatprep.subr.mxu0 %v1069_v46 }
 0x8bc   :  { %v3293_v56 = vpop.eup %3292 }
 0x8bd   :  { %v965_v63 = vmul.f32 %v3293_v56, %v3289_v44  ;;  %v2832_v56 = vld [vmem:[#allocation8 + $0x5] ss:$0 sm:$0xff] }
 0x8c0   :  { %v3295_v60 = vpop.eup %3294 }
 0x8c1   :  { %v963_v62 = vmul.f32 %v3295_v60, %v3291_v47 }
 0x8c3   :  { %3085 = vmatprep.mubr.msk.f32.mxu0 %vm313_vm7, %v963_v62 }
 0x8c4   :  { %3086 = vmatmul.mubr.msk.f32.vlgmr.msra.gmra.mxu0 %vm313_vm7, %v965_v63 }
 0x8c5   :  { %3089 = vmatpush3.msra.mxu0 %v1069_v46 }
 0x8c6   :  { %3090 = vmatprep.subr.mxu0 %v1068_v2 }
 0x8c7   :  { %3091 = vmatpush3.msra.mxu0 %v1068_v2 }
 0x8c8   :  { %3092 = vmatprep.subr.mxu0 %v1067_v3 }
 0x8c9   :  { %3093 = vmatpush3.msra.mxu0 %v1067_v3 }
 0x8ca   :  { %3094 = vmatprep.subr.mxu0 %v1066_v4 }
 0x8cb   :  { %3095 = vmatpush3.msra.mxu0 %v1066_v4  ;;  %v1307_v4 = vld [vmem:[%s4025_s4 + $0x18] sm:$0xff] }
 0x8cc   :  { %3110 = vmatprep.subr.mxu0 %v1311_v30 }
 0x984   :  { %v3087_v5 = vpop.f32.mrf.mxu0 }
 0x985   :  { %1057 = vrot.lane.b32.xlu1 %v3087_v5, %s3465_s9  ;;  %v1306_v5 = vld [vmem:[%s4025_s4 + $0x10] sm:$0xff] }
 0x986   :  { %v1044_v6 = vpop.f32.mrf.mxu0 }
 0x987   :  { %1055 = vrot.lane.b32.xlu0 %v1044_v6, %s3465_s9  ;;  %v1305_v6 = vld [vmem:[%s4025_s4 + $0x8] sm:$0xff] }
 0x9f7   :  { %v1058_v7 = vpop.permute.xlu1 %1057 }
 0x9f8   :  { %1063 = vst.msk [vmem:[#allocation2 + $0x8] sm:$0xff] %vm1061_vm11, %v1058_v7  ;;  %v1304_v7 = vld [vmem:[%s4025_s4] sm:$0xff] }
 0x9f9   :  { %v1056_v8 = vpop.permute.xlu0 %1055 }
 0x9fa   :  { %1062 = vst.msk [vmem:[#allocation2] sm:$0xff] %vm1061_vm11, %v1056_v8  ;;  %v2833_v8 = vld [vmem:[#allocation8 + $0x6] ss:$0 sm:$0xff] }
 0x9ff   :  { %v1065_v10 = vld [vmem:[#allocation2 + $0x8] sm:$0xff] }
 0xa01   :  { %v1064_v9 = vld [vmem:[#allocation2] sm:$0xff] }
 0xa02   :  { %3096 = vmatprep.mubr.msk.f32.mxu0 %vm73_vm0, %v1064_v9 }
 0xa03   :  { %3097 = vmatmul.mubr.msk.f32.vlgmr.msra.gmra.mxu0 %vm73_vm0, %v1065_v10 }
 0xa04   :  { %3111 = vmatpush3.msra.mxu0 %v1311_v30  ;;  %v2844_v30 = vld [vmem:[%s4024_s3 + $0xa8] sm:$0xff] }
 0xa05   :  { %3112 = vmatprep.subr.mxu0 %v1310_v31  ;;  %3129 = vmatprep.subr.mxu1 %v2844_v30 }
 0xa06   :  { %3113 = vmatpush3.msra.mxu0 %v1310_v31  ;;  %v2843_v31 = vld [vmem:[%s4024_s3 + $0x90] sm:$0xff] }
 0xa07   :  { %3114 = vmatprep.subr.mxu0 %v1309_v32 }
 0xa08   :  { %3115 = vmatpush3.msra.mxu0 %v1309_v32  ;;  %v2842_v32 = vld [vmem:[%s4024_s3 + $0x78] sm:$0xff] }
 0xa09   :  { %3116 = vmatprep.subr.mxu0 %v1308_v33 }
 0xa0a   :  { %3117 = vmatpush3.msra.mxu0 %v1308_v33  ;;  %v2841_v33 = vld [vmem:[%s4024_s3 + $0x60] sm:$0xff] }
 0xa0b   :  { %3118 = vmatprep.subr.mxu0 %v1307_v4 }
 0xa0c   :  { %3119 = vmatpush3.msra.mxu0 %v1307_v4  ;;  %v2845_v4 = vld [vmem:[#allocation8 + $0xa] ss:$0 sm:$0xff] }
 0xa0d   :  { %3120 = vmatprep.subr.mxu0 %v1306_v5 }
 0xa0e   :  { %3121 = vmatpush3.msra.mxu0 %v1306_v5 }
 0xa0f   :  { %3122 = vmatprep.subr.mxu0 %v1305_v6 }
 0xa10   :  { %3123 = vmatpush3.msra.mxu0 %v1305_v6 }
 0xa11   :  { %3124 = vmatprep.subr.mxu0 %v1304_v7 }
 0xa12   :  { %3125 = vmatpush3.msra.mxu0 %v1304_v7 }
 0xac3   :  { %v3098_v12 = vpop.f32.mrf.mxu0 }
 0xac4   :  { %v1153_v13 = vadd.f32 %v3098_v12, %v2828_v11 }
 0xac5   :  { %v1147_v14 = vpop.f32.mrf.mxu0 }
 0xac6   :  { %v3714_v15 = vadd.f32 %v1153_v13, %v3517_v1  ;;  %v1148_v16 = vadd.f32 %v2828_v11, %v1147_v14 }
 0xac8   :  { %v3717_v50 = vadd.f32 %v1148_v16, %v3515_v0  ;;  %v1163_v17 = vsel %vm73_vm0, %v3714_v15, 0.0  ;;  %v2836_v16 = vld [vmem:[#allocation8 + $0x7] ss:$0 sm:$0xff] }
 0xac9   :  { %1164 = vadd.xlane.f32.xlu1 %v1163_v17 }
 0xaca   :  { %v1160_v18 = vsel %vm73_vm0, %v3717_v50, 0.0 }
 0xacb   :  { %1161 = vadd.xlane.f32.xlu0 %v1160_v18 }
 0xb52   :  { %v1165_v19 = vpop.xlane.xlu1 %1164 }
 0xb53   :  { %v1167_v20 = vmul.f32 0.03125, %v1165_v19 }
 0xb54   :  { %v1162_v21 = vpop.xlane.xlu0 %1161 }
 0xb55   :  { %v1166_v22 = vmul.f32 0.03125, %v1162_v21  ;;  %v1169_v23 = vsub.f32 %v3714_v15, %v1167_v20 }
 0xb57   :  { %v1168_v1 = vsub.f32 %v3717_v50, %v1166_v22  ;;  %v1171_v49 = vmul.f32 %v1169_v23, %v1169_v23 }
 0xb59   :  { %v1170_v24 = vmul.f32 %v1168_v1, %v1168_v1  ;;  %v1175_v25 = vsel %vm73_vm0, %v1171_v49, 0.0 }
 0xb5b   :  { %v1172_v0 = vsel %vm73_vm0, %v1170_v24, 0.0 }
 0xb5c   :  { %1173 = vadd.xlane.f32.xlu0 %v1172_v0 }
 0xb60   :  { %1176 = vadd.xlane.f32.xlu0 %v1175_v25 }
 0xbe5   :  { %v1174_v34 = vpop.xlane.xlu0 %1173 }
 0xbe6   :  { %v1178_v35 = vmul.f32 0.032258064, %v1174_v34 }
 0xbe8   :  { %3296 = vrsqrt.f32 %v1178_v35  ;;  %vm1182_vm12 = vcmp.eq.f32.partialorder %v1178_v35, inf  ;;  %v1185_v40 = vand.u32 2147483648, %v1178_v35  ;;  %vm1184_vm13 = vcmp.eq.f32.partialorder %v1178_v35, 0.0 }
 0xbe9   :  { %v1177_v36 = vpop.xlane.xlu0 %1176 }
 0xbea   :  { %v1179_v37 = vmul.f32 0.032258064, %v1177_v36 }
 0xbec   :  { %3298 = vrsqrt.f32 %v1179_v37  ;;  %vm1189_vm14 = vcmp.eq.f32.partialorder %v1179_v37, inf  ;;  %v1192_v45 = vand.u32 2147483648, %v1179_v37  ;;  %vm1191_vm15 = vcmp.eq.f32.partialorder %v1179_v37, 0.0 }
 0xbf5   :  { %v3297_v38 = vpop.eup %3296 }
 0xbf6   :  { %v1181_v39 = vmul.f32 %v3297_v38, %v1178_v35 }
 0xbf8   :  { %v1183_v41 = vsel %vm1182_vm12, %v1178_v35, %v1181_v39 }
 0xbf9   :  { %v3299_v48 = vpop.eup %3298  ;;  %v1186_v42 = vsel %vm1184_vm13, %v1185_v40, %v1183_v41 }
 0xbfa   :  { %v1194_v43 = vadd.f32 1e-06, %v1186_v42  ;;  %v1188_v44 = vmul.f32 %v3299_v48, %v1179_v37 }
 0xbfc   :  { %3300 = vrcp.f32 %v1194_v43  ;;  %v1190_v47 = vsel %vm1189_vm14, %v1179_v37, %v1188_v44 }
 0xbfd   :  { %v1193_v51 = vsel %vm1191_vm15, %v1192_v45, %v1190_v47 }
 0xbfe   :  { %v1195_v52 = vadd.f32 1e-06, %v1193_v51 }
 0xc00   :  { %3302 = vrcp.f32 %v1195_v52 }
 0xc09   :  { %v3301_v53 = vpop.eup %3300 }
 0xc0a   :  { %v1197_v55 = vmul.f32 %v3301_v53, %v1168_v1 }
 0xc0c   :  { %v1204_v60 = vmul.f32 %v2831_v54, %v1197_v55  ;;  %v2839_v55 = vld [vmem:[#allocation8 + $0x8] ss:$0 sm:$0xff] }
 0xc0d   :  { %v3303_v62 = vpop.eup %3302 }
 0xc0e   :  { %v1199_v63 = vmul.f32 %v3303_v62, %v1169_v23  ;;  %v1210_v46 = vadd.f32 %v2832_v56, %v1204_v60 }
 0xc10   :  { %v1205_v2 = vmul.f32 %v2831_v54, %v1199_v63  ;;  %3107 = vmatprep.mubr.msk.f32.mxu1 %vm73_vm0, %v1210_v46  ;;  %v2840_v63 = vld [vmem:[#allocation8 + $0x9] ss:$0 sm:$0xff] }
 0xc12   :  { %v1211_v3 = vadd.f32 %v2832_v56, %v1205_v2 }
 0xc14   :  { %3108 = vmatmul.mubr.msk.f32.vlgmr.msra.gmra.mxu1 %vm73_vm0, %v1211_v3 }
 0xc15   :  { %3130 = vmatpush3.msra.mxu1 %v2844_v30 }
 0xc16   :  { %3131 = vmatprep.subr.mxu1 %v2843_v31 }
 0xc17   :  { %3132 = vmatpush3.msra.mxu1 %v2843_v31 }
 0xc18   :  { %3133 = vmatprep.subr.mxu1 %v2842_v32 }
 0xc19   :  { %3134 = vmatpush3.msra.mxu1 %v2842_v32 }
 0xc1a   :  { %3135 = vmatprep.subr.mxu1 %v2841_v33 }
 0xc1b   :  { %3136 = vmatpush3.msra.mxu1 %v2841_v33 }
 0xcd4   :  { %v3109_v9 = vpop.f32.mrf.mxu1 }
 0xcd5   :  { %v1299_v10 = vadd.f32 %v3109_v9, %v2833_v8 }
 0xcd6   :  { %v1293_v11 = vpop.f32.mrf.mxu1 }
 0xcd7   :  { %v1294_v12 = vadd.f32 %v2833_v8, %v1293_v11  ;;  %v1303_v14 = vmax.f32 %v1299_v10, 0.0 }
 0xcd9   :  { %v1302_v13 = vmax.f32 %v1294_v12, 0.0 }
 0xcdb   :  { %3126 = vmatprep.mubr.msk.f32.mxu0 %vm1317_vm1, %v1302_v13 }
 0xcdc   :  { %3127 = vmatmul.mubr.msk.f32.vlgmr.msra.gmra.mxu0 %vm1317_vm1, %v1303_v14 }
 0xd9c   :  { %v3128_v17 = vpop.f32.mrf.mxu0 }
 0xd9d   :  { %v1396_v18 = vadd.f32 %v3128_v17, %v2836_v16 }
 0xd9e   :  { %v1390_v19 = vpop.f32.mrf.mxu0 }
 0xd9f   :  { %v3768_v20 = vadd.f32 %v1396_v18, %v3714_v15  ;;  %v1391_v21 = vadd.f32 %v2836_v16, %v1390_v19 }
 0xda1   :  { %v3771_v22 = vadd.f32 %v1391_v21, %v3717_v50  ;;  %v1406_v23 = vsel %vm73_vm0, %v3768_v20, 0.0 }
 0xda2   :  { %1407 = vadd.xlane.f32.xlu1 %v1406_v23 }
 0xda3   :  { %v1403_v1 = vsel %vm73_vm0, %v3771_v22, 0.0 }
 0xda4   :  { %1404 = vadd.xlane.f32.xlu0 %v1403_v1 }
 0xe2b   :  { %v1408_v24 = vpop.xlane.xlu1 %1407 }
 0xe2c   :  { %v1410_v0 = vmul.f32 0.03125, %v1408_v24 }
 0xe2d   :  { %v1405_v49 = vpop.xlane.xlu0 %1404 }
 0xe2e   :  { %v1412_v25 = vsub.f32 %v3768_v20, %v1410_v0  ;;  %v1409_v26 = vmul.f32 0.03125, %v1405_v49 }
 0xe30   :  { %v1411_v15 = vsub.f32 %v3771_v22, %v1409_v26  ;;  %v1414_v27 = vmul.f32 %v1412_v25, %v1412_v25 }
 0xe32   :  { %v1418_v50 = vsel %vm73_vm0, %v1414_v27, 0.0  ;;  %v1413_v28 = vmul.f32 %v1411_v15, %v1411_v15 }
 0xe33   :  { %1419 = vadd.xlane.f32.xlu1 %v1418_v50 }
 0xe34   :  { %v1415_v29 = vsel %vm73_vm0, %v1413_v28, 0.0 }
 0xe35   :  { %1416 = vadd.xlane.f32.xlu0 %v1415_v29 }
 0xebc   :  { %v1420_v34 = vpop.xlane.xlu1 %1419 }
 0xebd   :  { %v1422_v35 = vmul.f32 0.032258064, %v1420_v34 }
 0xebe   :  { %v1417_v36 = vpop.xlane.xlu0 %1416 }
 0xebf   :  { %3304 = vrsqrt.f32 %v1422_v35  ;;  %v1421_v37 = vmul.f32 0.032258064, %v1417_v36  ;;  %vm1432_vm2 = vcmp.eq.f32.partialorder %v1422_v35, inf  ;;  %v1435_v40 = vand.u32 2147483648, %v1422_v35 }
 0xec0   :  { %vm1434_vm3 = vcmp.eq.f32.partialorder %v1422_v35, 0.0 }
 0xec1   :  { %3306 = vrsqrt.f32 %v1421_v37  ;;  %vm1425_vm4 = vcmp.eq.f32.partialorder %v1421_v37, inf  ;;  %v1428_v45 = vand.u32 2147483648, %v1421_v37  ;;  %vm1427_vm12 = vcmp.eq.f32.partialorder %v1421_v37, 0.0 }
 0xecc   :  { %v3305_v38 = vpop.eup %3304 }
 0xecd   :  { %v1431_v39 = vmul.f32 %v3305_v38, %v1422_v35 }
 0xece   :  { %v3307_v41 = vpop.eup %3306 }
 0xecf   :  { %v1433_v48 = vsel %vm1432_vm2, %v1422_v35, %v1431_v39  ;;  %v1424_v43 = vmul.f32 %v3307_v41, %v1421_v37 }
 0xed0   :  { %v1436_v42 = vsel %vm1434_vm3, %v1435_v40, %v1433_v48 }
 0xed1   :  { %v1438_v44 = vadd.f32 1e-06, %v1436_v42  ;;  %v1426_v47 = vsel %vm1425_vm4, %v1421_v37, %v1424_v43 }
 0xed2   :  { %v1429_v51 = vsel %vm1427_vm12, %v1428_v45, %v1426_v47 }
 0xed3   :  { %3308 = vrcp.f32 %v1438_v44  ;;  %v1437_v52 = vadd.f32 1e-06, %v1429_v51 }
 0xed5   :  { %3310 = vrcp.f32 %v1437_v52 }
 0xee0   :  { %v3309_v53 = vpop.eup %3308 }
 0xee1   :  { %v1442_v54 = vmul.f32 %v3309_v53, %v1412_v25 }
 0xee2   :  { %v3311_v56 = vpop.eup %3310 }
 0xee3   :  { %v1440_v60 = vmul.f32 %v3311_v56, %v1411_v15  ;;  %v1448_v62 = vmul.f32 %v2839_v55, %v1442_v54 }
 0xee5   :  { %v1447_v46 = vmul.f32 %v2839_v55, %v1440_v60  ;;  %v1454_v3 = vadd.f32 %v2840_v63, %v1448_v62 }
 0xee7   :  { %v1453_v2 = vadd.f32 %v2840_v63, %v1447_v46 }
 0xee9   :  { %3137 = vmatprep.mubr.msk.f32.mxu1 %vm73_vm0, %v1453_v2 }
 0xeea   :  { %3138 = vmatmul.mubr.msk.f32.vlgmr.msra.gmra.mxu1 %vm73_vm0, %v1454_v3 }
 0xfaa   :  { %v3139_v5 = vpop.f32.mrf.mxu1 }
 0xfab   :  { %v3795_v6 = vadd.f32 %v3139_v5, %v2845_v4 }
 0xfac   :  { %v1537_v7 = vpop.f32.mrf.mxu1 }
 0xfad   :  { %v3797_v8 = vadd.f32 %v2845_v4, %v1537_v7  ;;  %1552 = vrot.lane.b32.xlu0 %v3795_v6, %s3453_s15  ;;  %v3815_v10 = vmul.f32 0.35355338, %v3795_v6 }
 0xfaf   :  { %1550 = vrot.lane.b32.xlu1 %v3797_v8, %s3453_s15  ;;  %v3804_v9 = vmul.f32 0.35355338, %v3797_v8 }
 0xfb1   :  { %1752 = vrot.lane.b32.xlu0 %v3804_v9, %s3454_s16  ;;  %3144 = vmatprep.mubr.msk.f32.mxu1 %vm225_vm5, %v3804_v9 }
 0xfb3   :  { %1758 = vrot.lane.b32.xlu1 %v3795_v6, %s3455_s17 }
 0xfb7   :  { %1756 = vrot.lane.b32.xlu1 %v3797_v8, %s3455_s17 }
 0xfbb   :  { %1754 = vrot.lane.b32.xlu1 %v3815_v10, %s3454_s16 }
0x101f   :  { %v1553_v11 = vpop.permute.xlu0 %1552 }
0x1020   :  { %3140 = vmatprep.subr.msk.mxu1 %vm225_vm5, %v1553_v11 }
0x1021   :  { %3141 = vmatpush3.xpose.msk.msra.mxu1 %vm225_vm5, %v1553_v11  ;;  %v1551_v12 = vpop.permute.xlu1 %1550 }
0x1022   :  { %3142 = vmatprep.subr.msk.mxu1 %vm225_vm5, %v1551_v12 }
0x1023   :  { %v1753_v14 = vpop.permute.xlu0 %1752 }
0x1025   :  { %3143 = vmatpush3.xpose.msk.msra.mxu1 %vm225_vm5, %v1551_v12  ;;  %v1759_v13 = vpop.permute.xlu1 %1758 }
0x1026   :  { %3154 = vmatprep.subr.msk.mxu1 %vm225_vm5, %v1759_v13 }
0x1028   :  { %3145 = vmatmul.mubr.msk.f32.vlgmr.msra.gmra.mxu1 %vm225_vm5, %v3815_v10 }
0x1029   :  { %v1757_v16 = vpop.permute.xlu1 %1756  ;;  %3155 = vmatpush3.xpose.msk.msra.mxu1 %vm225_vm5, %v1759_v13  ;;  %3158 = vmatprep.mubr.msk.f32.mxu1 %vm225_vm5, %v1753_v14 }
0x102a   :  { %3156 = vmatprep.subr.msk.mxu1 %vm225_vm5, %v1757_v16 }
0x102d   :  { %3157 = vmatpush3.xpose.msk.msra.mxu1 %vm225_vm5, %v1757_v16  ;;  %v1755_v17 = vpop.permute.xlu1 %1754 }
0x1030   :  { %3159 = vmatmul.mubr.msk.f32.vlgmr.msra.gmra.mxu1 %vm225_vm5, %v1755_v17 }
0x10e8   :  { %v3146_v18 = vpop.f32.mrf.mxu1 }
0x10e9   :  { %v1640_v19 = vsel %vm67_vm6, %v3582_v59, %v3146_v18 }
0x10ea   :  { %v1630_v21 = vpop.f32.mrf.mxu1  ;;  %v1644_v23 = vsel %vm313_vm7, %v1640_v19, -inf }
0x10eb   :  { %1645 = vmax.xlane.f32.xlu1 %v1644_v23  ;;  %v1639_v1 = vsel %vm66_vm8, %v3585_v61, %v1630_v21 }
0x10ec   :  { %v1641_v24 = vsel %vm313_vm7, %v1639_v1, -inf }
0x10ed   :  { %1642 = vmax.xlane.f32.xlu0 %v1641_v24  ;;  %v3361_v24 = vld [vmem:[#allocation6 + $0x10] sm:$0xff] }
0x10f0   :  { %v3160_v0 = vpop.f32.mrf.mxu1 }
0x10f1   :  { %v1844_v15 = vsel %vm67_vm6, %v3582_v59, %v3160_v0 }
0x10f2   :  { %v1834_v49 = vpop.f32.mrf.mxu1  ;;  %v1848_v27 = vsel %vm313_vm7, %v1844_v15, -inf }
0x10f3   :  { %v1843_v25 = vsel %vm66_vm8, %v3585_v61, %v1834_v49 }
0x10f4   :  { %v1845_v26 = vsel %vm313_vm7, %v1843_v25, -inf }
0x10f5   :  { %1846 = vmax.xlane.f32.xlu0 %v1845_v26 }
0x10f9   :  { %1849 = vmax.xlane.f32.xlu0 %v1848_v27 }
0x10fc   :  { %1663 = vrot.lane.b32.xlu1 %v3797_v8, %s3456_s18 }
0x1100   :  { %1869 = vrot.lane.b32.xlu1 %v3795_v6, %s3457_s19 }
0x1104   :  { %1867 = vrot.lane.b32.xlu1 %v3797_v8, %s3457_s19 }
0x110f   :  { %1665 = vrot.lane.b32.xlu0 %v3795_v6, %s3456_s18 }
0x1174   :  { %v1646_v61 = vpop.xlane.xlu1 %1645 }
0x1175   :  { %v1648_v50 = vsub.f32 %v1640_v19, %v1646_v61  ;;  %v3360_v19 = vld [vmem:[#allocation6 + $0x18] sm:$0xff] }
0x1176   :  { %v1643_v28 = vpop.xlane.xlu0 %1642 }
0x1177   :  { %v1651_v29 = vmul.f32 1.442695, %v1648_v50  ;;  %v1647_v59 = vsub.f32 %v1639_v1, %v1643_v28 }
0x1178   :  { %v1664_v36 = vpop.permute.xlu1 %1663 }
0x1179   :  { %3312 = vpow2.f32 %v1651_v29  ;;  %v1649_v30 = vmul.f32 1.442695, %v1647_v59 }
0x117b   :  { %3314 = vpow2.f32 %v1649_v30 }
0x117c   :  { %v1870_v42 = vpop.permute.xlu1 %1869 }
0x117e   :  { %v1847_v31 = vpop.xlane.xlu0 %1846 }
0x117f   :  { %v1851_v32 = vsub.f32 %v1843_v25, %v1847_v31 }
0x1180   :  { %v1868_v51 = vpop.permute.xlu1 %1867 }
0x1181   :  { %v1853_v33 = vmul.f32 1.442695, %v1851_v32 }
0x1182   :  { %v1850_v34 = vpop.xlane.xlu0 %1849 }
0x1183   :  { %3316 = vpow2.f32 %v1853_v33  ;;  %v1852_v35 = vsub.f32 %v1844_v15, %v1850_v34 }
0x1185   :  { %v1855_v37 = vmul.f32 1.442695, %v1852_v35 }
0x1186   :  { %v3313_v38 = vpop.eup %3312  ;;  %v1666_v39 = vpop.permute.xlu0 %1665 }
0x1187   :  { %3318 = vpow2.f32 %v1855_v37  ;;  %3147 = vmatprep.subr.mxu0 %v1666_v39  ;;  %v1656_v40 = vsel %vm313_vm7, %v3313_v38, 0.0 }
0x1188   :  { %v3315_v41 = vpop.eup %3314  ;;  %1657 = vadd.xlane.f32.xlu1 %v1656_v40  ;;  %3148 = vmatpush3.msra.mxu0 %v1666_v39 }
0x1189   :  { %3149 = vmatprep.subr.mxu0 %v1664_v36  ;;  %v1653_v48 = vsel %vm313_vm7, %v3315_v41, 0.0 }
0x118a   :  { %1654 = vadd.xlane.f32.xlu0 %v1653_v48  ;;  %3150 = vmatpush3.msra.mxu0 %v1664_v36 }
0x118b   :  { %3161 = vmatprep.subr.mxu0 %v1870_v42 }
0x1190   :  { %v3317_v43 = vpop.eup %3316 }
0x1191   :  { %v1857_v44 = vsel %vm313_vm7, %v3317_v43, 0.0 }
0x1192   :  { %1858 = vadd.xlane.f32.xlu0 %v1857_v44 }
0x1194   :  { %v3319_v45 = vpop.eup %3318 }
0x1195   :  { %v1860_v47 = vsel %vm313_vm7, %v3319_v45, 0.0 }
0x1196   :  { %1861 = vadd.xlane.f32.xlu1 %v1860_v47 }
0x11a7   :  { %1968 = vrot.lane.b32.xlu1 %v3797_v8, %s3458_s20 }
0x11a8   :  { %1970 = vrot.lane.b32.xlu0 %v3795_v6, %s3458_s20 }
0x11ab   :  { %1966 = vrot.lane.b32.xlu1 %v3815_v10, %s3459_s21 }
0x11ac   :  { %1964 = vrot.lane.b32.xlu0 %v3804_v9, %s3459_s21 }
0x1211   :  { %v1658_v52 = vpop.xlane.xlu1 %1657 }
0x1212   :  { %3320 = vrcp.f32 %v1658_v52 }
0x1213   :  { %v1655_v53 = vpop.xlane.xlu0 %1654 }
0x1214   :  { %3322 = vrcp.f32 %v1655_v53 }
0x121b   :  { %v1859_v54 = vpop.xlane.xlu0 %1858 }
0x121c   :  { %3324 = vrcp.f32 %v1859_v54 }
0x121f   :  { %v1862_v55 = vpop.xlane.xlu1 %1861  ;;  %v3321_v56 = vpop.eup %3320 }
0x1220   :  { %3326 = vrcp.f32 %v1862_v55  ;;  %v1662_v63 = vmul.f32 %v3321_v56, %v3313_v38  ;;  %v1971_v46 = vpop.permute.xlu0 %1970 }
0x1221   :  { %v3323_v60 = vpop.eup %3322 }
0x1222   :  { %v1660_v62 = vmul.f32 %v3323_v60, %v3315_v41 }
0x1223   :  { %v1969_v11 = vpop.permute.xlu1 %1968 }
0x1224   :  { %3151 = vmatprep.mubr.msk.f32.mxu0 %vm313_vm7, %v1660_v62  ;;  %v1965_v7 = vpop.permute.xlu0 %1964 }
0x1225   :  { %3152 = vmatmul.mubr.msk.f32.vlgmr.msra.gmra.mxu0 %vm313_vm7, %v1662_v63 }
0x1226   :  { %3162 = vmatpush3.msra.mxu0 %v1870_v42 }
0x1227   :  { %3163 = vmatprep.subr.mxu0 %v1868_v51  ;;  %v1967_v12 = vpop.permute.xlu1 %1966 }
0x1228   :  { %3164 = vmatpush3.msra.mxu0 %v1868_v51 }
0x1229   :  { %v3325_v2 = vpop.eup %3324  ;;  %3168 = vmatprep.subr.msk.mxu0 %vm225_vm5, %v1971_v46 }
0x122a   :  { %v1864_v3 = vmul.f32 %v3325_v2, %v3317_v43 }
0x122c   :  { %3165 = vmatprep.mubr.msk.f32.mxu0 %vm313_vm7, %v1864_v3 }
0x122d   :  { %v3327_v4 = vpop.eup %3326 }
0x122e   :  { %v1866_v5 = vmul.f32 %v3327_v4, %v3319_v45 }
0x1230   :  { %3166 = vmatmul.mubr.msk.f32.vlgmr.msra.gmra.mxu0 %vm313_vm7, %v1866_v5 }
0x1231   :  { %3169 = vmatpush3.xpose.msk.msra.mxu0 %vm225_vm5, %v1971_v46  ;;  %3172 = vmatprep.mubr.msk.f32.mxu0 %vm225_vm5, %v1965_v7 }
0x1232   :  { %3170 = vmatprep.subr.msk.mxu0 %vm225_vm5, %v1969_v11 }
0x1235   :  { %3171 = vmatpush3.xpose.msk.msra.mxu0 %vm225_vm5, %v1969_v11 }
0x1238   :  { %3173 = vmatmul.mubr.msk.f32.vlgmr.msra.gmra.mxu0 %vm225_vm5, %v1967_v12 }
0x12e5   :  { %v3153_v13 = vpop.f32.mrf.mxu0 }
0x12e6   :  { %1751 = vst.msk [vmem:[#allocation2 + $0x8] sm:$0xff] %vm225_vm5, %v3153_v13 }
0x12e7   :  { %v1741_v14 = vpop.f32.mrf.mxu0 }
0x12e8   :  { %1750 = vst.msk [vmem:[#allocation2] sm:$0xff] %vm225_vm5, %v1741_v14 }
0x12f0   :  { %v3879_v16 = vpop.f32.mrf.mxu0 }
0x12f2   :  { %v3881_v17 = vpop.f32.mrf.mxu0 }
0x12f8   :  { %v3174_v18 = vpop.f32.mrf.mxu0 }
0x12f9   :  { %v2056_v21 = vsel %vm67_vm6, %v3360_v19, %v3174_v18  ;;  %v2873_v18 = vld [vmem:[%s4024_s3 + $0x80] sm:$0xff] }
0x12fa   :  { %v2046_v23 = vpop.f32.mrf.mxu0  ;;  %v2060_v1 = vsel %vm313_vm7, %v2056_v21, -inf }
0x12fb   :  { %2061 = vmax.xlane.f32.xlu1 %v2060_v1  ;;  %v2055_v0 = vsel %vm66_vm8, %v3361_v24, %v2046_v23 }
0x12fc   :  { %v2057_v49 = vsel %vm313_vm7, %v2055_v0, -inf }
0x12fd   :  { %2058 = vmax.xlane.f32.xlu0 %v2057_v49 }
0x130c   :  { %2079 = vrot.lane.b32.xlu1 %v3797_v8, %s3460_s22 }
0x1310   :  { %2182 = vrot.lane.b32.xlu1 %v3795_v6, %s3461_s25 }
0x1314   :  { %2180 = vrot.lane.b32.xlu1 %v3797_v8, %s3461_s25 }
0x1318   :  { %2178 = vrot.lane.b32.xlu1 %v3815_v10, %s3462_s26 }
0x1384   :  { %v2062_v25 = vpop.xlane.xlu1 %2061 }
0x1385   :  { %v2064_v26 = vsub.f32 %v2056_v21, %v2062_v25  ;;  %v2876_v25 = vld [vmem:[#allocation8 + $0xb] ss:$0 sm:$0xff] }
0x1386   :  { %v2059_v15 = vpop.xlane.xlu0 %2058 }
0x1387   :  { %v2067_v27 = vmul.f32 1.442695, %v2064_v26  ;;  %v2063_v61 = vsub.f32 %v2055_v0, %v2059_v15 }
0x1388   :  { %v2080_v32 = vpop.permute.xlu1 %2079 }
0x1389   :  { %3328 = vpow2.f32 %v2067_v27  ;;  %v2065_v50 = vmul.f32 1.442695, %v2063_v61 }
0x138b   :  { %3330 = vpow2.f32 %v2065_v50 }
0x138c   :  { %v2183_v34 = vpop.permute.xlu1 %2182 }
0x1390   :  { %v2181_v39 = vpop.permute.xlu1 %2180 }
0x1394   :  { %v2179_v40 = vpop.permute.xlu1 %2178 }
0x1396   :  { %v3329_v28 = vpop.eup %3328 }
0x1397   :  { %v2072_v29 = vsel %vm313_vm7, %v3329_v28, 0.0 }
0x1398   :  { %v3331_v59 = vpop.eup %3330  ;;  %2073 = vadd.xlane.f32.xlu0 %v2072_v29 }
0x1399   :  { %v2069_v30 = vsel %vm313_vm7, %v3331_v59, 0.0 }
0x139c   :  { %2070 = vadd.xlane.f32.xlu0 %v2069_v30 }
0x13b2   :  { %2081 = vrot.lane.b32.xlu0 %v3795_v6, %s3460_s22 }
0x13b6   :  { %2176 = vrot.lane.b32.xlu0 %v3804_v9, %s3462_s26 }
0x1421   :  { %v2074_v10 = vpop.xlane.xlu0 %2073 }
0x1422   :  { %3332 = vrcp.f32 %v2074_v10 }
0x1425   :  { %v2071_v31 = vpop.xlane.xlu0 %2070 }
0x1426   :  { %3334 = vrcp.f32 %v2071_v31 }
0x1429   :  { %v2082_v33 = vpop.permute.xlu0 %2081 }
0x142a   :  { %3175 = vmatprep.subr.mxu1 %v2082_v33 }
0x142b   :  { %3176 = vmatpush3.msra.mxu1 %v2082_v33 }
0x142c   :  { %3177 = vmatprep.subr.mxu1 %v2080_v32 }
0x142d   :  { %3178 = vmatpush3.msra.mxu1 %v2080_v32  ;;  %v2177_v9 = vpop.permute.xlu0 %2176 }
0x142e   :  { %3182 = vmatprep.subr.msk.mxu1 %vm225_vm5, %v2183_v34 }
0x142f   :  { %v3333_v35 = vpop.eup %3332 }
0x1430   :  { %v2078_v38 = vmul.f32 %v3333_v35, %v3329_v28 }
0x1433   :  { %v3335_v36 = vpop.eup %3334 }
0x1434   :  { %v2076_v37 = vmul.f32 %v3335_v36, %v3331_v59 }
0x1436   :  { %3179 = vmatprep.mubr.msk.f32.mxu1 %vm313_vm7, %v2076_v37  ;;  %v2884_v37 = vld [vmem:[%s4024_s3 + $0xb8] sm:$0xff] }
0x1437   :  { %3180 = vmatmul.mubr.msk.f32.vlgmr.msra.gmra.mxu1 %vm313_vm7, %v2078_v38  ;;  %v2883_v38 = vld [vmem:[%s4024_s3 + $0xa0] sm:$0xff] }
0x1438   :  { %3183 = vmatpush3.xpose.msk.msra.mxu1 %vm225_vm5, %v2183_v34  ;;  %3186 = vmatprep.mubr.msk.f32.mxu1 %vm225_vm5, %v2177_v9  ;;  %v2882_v9 = vld [vmem:[%s4024_s3 + $0x88] sm:$0xff] }
0x1439   :  { %3184 = vmatprep.subr.msk.mxu1 %vm225_vm5, %v2181_v39 }
0x143c   :  { %3185 = vmatpush3.xpose.msk.msra.mxu1 %vm225_vm5, %v2181_v39  ;;  %v2881_v39 = vld [vmem:[%s4024_s3 + $0x70] sm:$0xff] }
0x143d   :  { %3207 = vmatprep.subr.mxu1 %v2884_v37 }
0x143f   :  { %3187 = vmatmul.mubr.msk.f32.vlgmr.msra.gmra.mxu1 %vm225_vm5, %v2179_v40  ;;  %v2895_v40 = vld [vmem:[%s4025_s4 + $0x78] sm:$0xff] }
0x1440   :  { %3208 = vmatpush3.msra.mxu1 %v2884_v37 }
0x1441   :  { %3209 = vmatprep.subr.mxu1 %v2883_v38 }
0x1442   :  { %3210 = vmatpush3.msra.mxu1 %v2883_v38 }
0x1443   :  { %3211 = vmatprep.subr.mxu1 %v2882_v9 }
0x1444   :  { %3212 = vmatpush3.msra.mxu1 %v2882_v9 }
0x1445   :  { %3213 = vmatprep.subr.mxu1 %v2881_v39 }
0x1446   :  { %3214 = vmatpush3.msra.mxu1 %v2881_v39 }
0x14f7   :  { %v3181_v41 = vpop.f32.mrf.mxu1 }
0x14f9   :  { %v2157_v48 = vpop.f32.mrf.mxu1 }
0x14ff   :  { %v3188_v42 = vpop.f32.mrf.mxu1 }
0x1500   :  { %v2268_v43 = vsel %vm67_vm6, %v3360_v19, %v3188_v42  ;;  %v2872_v19 = vld [vmem:[%s4024_s3 + $0x68] sm:$0xff]  ;;  %v2892_v42 = vld [vmem:[%s4025_s4 + $0x60] sm:$0xff] }
0x1501   :  { %v2258_v44 = vpop.f32.mrf.mxu1  ;;  %v2272_v45 = vsel %vm313_vm7, %v2268_v43, -inf }
0x1502   :  { %2273 = vmax.xlane.f32.xlu1 %v2272_v45  ;;  %v2267_v47 = vsel %vm66_vm8, %v3361_v24, %v2258_v44 }
0x1503   :  { %v2269_v51 = vsel %vm313_vm7, %v2267_v47, -inf }
0x1504   :  { %2270 = vmax.xlane.f32.xlu0 %v2269_v51 }
0x1513   :  { %2291 = vrot.lane.b32.xlu1 %v3797_v8, %s3463_s27 }
0x1517   :  { %1956 = vrot.lane.b32.xlu1 %v3881_v17, %s3451_s24  ;;  %v2874_v17 = vld [vmem:[%s4024_s3 + $0x98] sm:$0xff] }
0x151b   :  { %1958 = vrot.lane.b32.xlu1 %v3879_v16, %s3451_s24 }
0x151f   :  { %2170 = vrot.lane.b32.xlu1 %v3181_v41, %s3464_s28  ;;  %v2894_v41 = vld [vmem:[%s4025_s4 + $0x70] sm:$0xff] }
0x158b   :  { %v2274_v57 = vpop.xlane.xlu1 %2273 }
0x158c   :  { %v2276_v52 = vsub.f32 %v2268_v43, %v2274_v57 }
0x158d   :  { %v2271_v53 = vpop.xlane.xlu0 %2270 }
0x158e   :  { %v2279_v54 = vmul.f32 1.442695, %v2276_v52  ;;  %v2275_v58 = vsub.f32 %v2267_v47, %v2271_v53 }
0x158f   :  { %v2292_v55 = vpop.permute.xlu1 %2291 }
0x1590   :  { %3336 = vpow2.f32 %v2279_v54  ;;  %v2277_v56 = vmul.f32 1.442695, %v2275_v58 }
0x1592   :  { %3338 = vpow2.f32 %v2277_v56 }
0x1593   :  { %v1957_v60 = vpop.permute.xlu1 %1956 }
0x1594   :  { %1962 = vst.msk [vmem:[#allocation2] sm:$0xff] %vm635_vm9, %v1957_v60 }
0x1597   :  { %v1959_v8 = vpop.permute.xlu1 %1958 }
0x1598   :  { %1963 = vst.msk [vmem:[#allocation2 + $0x8] sm:$0xff] %vm635_vm9, %v1959_v8 }
0x159b   :  { %v2171_v62 = vpop.permute.xlu1 %2170 }
0x159c   :  { %2175 = vst.msk [vmem:[#allocation2 + $0x8] sm:$0xff] %vm848_vm10, %v2171_v62 }
0x159d   :  { %v3337_v63 = vpop.eup %3336 }
0x159e   :  { %v2284_v46 = vsel %vm313_vm7, %v3337_v63, 0.0 }
0x159f   :  { %v3339_v2 = vpop.eup %3338  ;;  %2285 = vadd.xlane.f32.xlu0 %v2284_v46 }
0x15a0   :  { %v2281_v3 = vsel %vm313_vm7, %v3339_v2, 0.0 }
0x15a3   :  { %2282 = vadd.xlane.f32.xlu0 %v2281_v3 }
0x15b9   :  { %2293 = vrot.lane.b32.xlu0 %v3795_v6, %s3463_s27  ;;  %v2875_v6 = vld [vmem:[%s4024_s3 + $0xb0] sm:$0xff] }
0x15bd   :  { %2168 = vrot.lane.b32.xlu0 %v2157_v48, %s3464_s28  ;;  %v2893_v48 = vld [vmem:[%s4025_s4 + $0x68] sm:$0xff] }
0x1628   :  { %v2286_v4 = vpop.xlane.xlu0 %2285 }
0x1629   :  { %3340 = vrcp.f32 %v2286_v4  ;;  %v2880_v4 = vld [vmem:[#allocation8 + $0xd] ss:$0 sm:$0xff] }
0x162c   :  { %v2283_v5 = vpop.xlane.xlu0 %2282 }
0x162d   :  { %3342 = vrcp.f32 %v2283_v5 }
0x1630   :  { %v2294_v7 = vpop.permute.xlu0 %2293 }
0x1631   :  { %3189 = vmatprep.subr.mxu0 %v2294_v7 }
0x1632   :  { %3190 = vmatpush3.msra.mxu0 %v2294_v7 }
0x1633   :  { %3191 = vmatprep.subr.mxu0 %v2292_v55 }
0x1634   :  { %3192 = vmatpush3.msra.mxu0 %v2292_v55  ;;  %v2169_v11 = vpop.permute.xlu0 %2168 }
0x1635   :  { %2174 = vst.msk [vmem:[#allocation2] sm:$0xff] %vm848_vm10, %v2169_v11  ;;  %3196 = vmatprep.subr.mxu0 %v2875_v6 }
0x1636   :  { %v3341_v12 = vpop.eup %3340 }
0x1637   :  { %v2290_v16 = vmul.f32 %v3341_v12, %v3337_v63 }
0x163a   :  { %v3343_v13 = vpop.eup %3342 }
0x163b   :  { %v2288_v14 = vmul.f32 %v3343_v13, %v3339_v2  ;;  %v2879_v2 = vld [vmem:[#allocation8 + $0xc] ss:$0 sm:$0xff] }
0x163d   :  { %3193 = vmatprep.mubr.msk.f32.mxu0 %vm313_vm7, %v2288_v14 }
0x163e   :  { %3194 = vmatmul.mubr.msk.f32.vlgmr.msra.gmra.mxu0 %vm313_vm7, %v2290_v16  ;;  %v2891_v16 = vld [vmem:[%s4025_s4 + $0x58] sm:$0xff] }
0x163f   :  { %3197 = vmatpush3.msra.mxu0 %v2875_v6  ;;  %v2890_v6 = vld [vmem:[%s4025_s4 + $0x50] sm:$0xff] }
0x1640   :  { %3198 = vmatprep.subr.mxu0 %v2874_v17 }
0x1641   :  { %3199 = vmatpush3.msra.mxu0 %v2874_v17  ;;  %v2889_v17 = vld [vmem:[%s4025_s4 + $0x48] sm:$0xff] }
0x1642   :  { %3200 = vmatprep.subr.mxu0 %v2873_v18 }
0x1643   :  { %3201 = vmatpush3.msra.mxu0 %v2873_v18  ;;  %v2888_v18 = vld [vmem:[%s4025_s4 + $0x40] sm:$0xff]  ;;  %s3466_s4 = smov [#allocation9]  }
0x1644   :  { %3202 = vmatprep.subr.mxu0 %v2872_v19  ;;  %s2786_s20 = sshll.u32 %s3466_s4, 4  ;;  %s2787_s20 = int_to_ptr.vmem [resolvable:$true] %s2786_s20 }
0x1645   :  { %3203 = vmatpush3.msra.mxu0 %v2872_v19  ;;  %v2885_v19 = vld [vmem:[#allocation8 + $0xe] ss:$0 sm:$0xff]  ;;  %s3422_s21 = scalar_lea.vmem %s2787_s20, 256  ;;  %p3427_p2 = scmp.lt.s32.totalorder %s2787_s20, %s2787_s20 }
0x1646   :  { %3218 = vmatprep.subr.mxu0 %v2895_v40  ;;  %p3423_p1 = scmp.ne.s32.totalorder %s2787_s20, %s3422_s21  ;;  %p3428_p3 = scmp.lt.s32.totalorder %s3422_s21, %s3422_s21 }
0x1648   :  { %p3429_p4 = por %p3428_p3, %p3427_p2 }
0x164a   :  { %p3430_p5 = pnand %p3429_p4, %p3423_p1 }
0x16fe   :  { %v3195_v21 = vpop.f32.mrf.mxu0 }
0x16ff   :  { %2382 = vrot.lane.b32.xlu1 %v3195_v21, %s3465_s9 }
0x1700   :  { %v2369_v23 = vpop.f32.mrf.mxu0 }
0x1701   :  { %2380 = vrot.lane.b32.xlu0 %v2369_v23, %s3465_s9 }
0x1771   :  { %v2383_v1 = vpop.permute.xlu1 %2382 }
0x1772   :  { %2387 = vst.msk [vmem:[#allocation2 + $0x8] sm:$0xff] %vm1061_vm11, %v2383_v1 }
0x1773   :  { %v2381_v24 = vpop.permute.xlu0 %2380 }
0x1774   :  { %2386 = vst.msk [vmem:[#allocation2] sm:$0xff] %vm1061_vm11, %v2381_v24 }
0x1779   :  { %v2389_v49 = vld [vmem:[#allocation2 + $0x8] sm:$0xff] }
0x177b   :  { %v2388_v0 = vld [vmem:[#allocation2] sm:$0xff] }
0x177c   :  { %3204 = vmatprep.mubr.msk.f32.mxu0 %vm73_vm0, %v2388_v0 }
0x177d   :  { %3205 = vmatmul.mubr.msk.f32.vlgmr.msra.gmra.mxu0 %vm73_vm0, %v2389_v49 }
0x177e   :  { %3219 = vmatpush3.msra.mxu0 %v2895_v40 }
0x177f   :  { %3220 = vmatprep.subr.mxu0 %v2894_v41 }
0x1780   :  { %3221 = vmatpush3.msra.mxu0 %v2894_v41 }
0x1781   :  { %3222 = vmatprep.subr.mxu0 %v2893_v48 }
0x1782   :  { %3223 = vmatpush3.msra.mxu0 %v2893_v48 }
0x1783   :  { %3224 = vmatprep.subr.mxu0 %v2892_v42 }
0x1784   :  { %3225 = vmatpush3.msra.mxu0 %v2892_v42 }
0x1785   :  { %3226 = vmatprep.subr.mxu0 %v2891_v16 }
0x1786   :  { %3227 = vmatpush3.msra.mxu0 %v2891_v16 }
0x1787   :  { %3228 = vmatprep.subr.mxu0 %v2890_v6 }
0x1788   :  { %3229 = vmatpush3.msra.mxu0 %v2890_v6 }
0x1789   :  { %3230 = vmatprep.subr.mxu0 %v2889_v17 }
0x178a   :  { %3231 = vmatpush3.msra.mxu0 %v2889_v17 }
0x178b   :  { %3232 = vmatprep.subr.mxu0 %v2888_v18 }
0x178c   :  { %3233 = vmatpush3.msra.mxu0 %v2888_v18 }
0x183d   :  { %v3206_v26 = vpop.f32.mrf.mxu0 }
0x183e   :  { %v2477_v15 = vadd.f32 %v3206_v26, %v2876_v25 }
0x183f   :  { %v2471_v27 = vpop.f32.mrf.mxu0 }
0x1840   :  { %v3954_v61 = vadd.f32 %v2477_v15, %v3768_v20  ;;  %v2472_v50 = vadd.f32 %v2876_v25, %v2471_v27  ;;  %v2896_v25 = vld [vmem:[#allocation8 + $0xf] ss:$0 sm:$0xff] }
0x1842   :  { %v3957_v28 = vadd.f32 %v2472_v50, %v3771_v22  ;;  %v2487_v29 = vsel %vm73_vm0, %v3954_v61, 0.0 }
0x1843   :  { %2488 = vadd.xlane.f32.xlu1 %v2487_v29 }
0x1844   :  { %v2484_v59 = vsel %vm73_vm0, %v3957_v28, 0.0 }
0x1845   :  { %2485 = vadd.xlane.f32.xlu0 %v2484_v59 }
0x18cc   :  { %v2489_v30 = vpop.xlane.xlu1 %2488 }
0x18cd   :  { %v2491_v10 = vmul.f32 0.03125, %v2489_v30 }
0x18ce   :  { %v2486_v31 = vpop.xlane.xlu0 %2485 }
0x18cf   :  { %v2490_v32 = vmul.f32 0.03125, %v2486_v31  ;;  %v2493_v33 = vsub.f32 %v3954_v61, %v2491_v10 }
0x18d1   :  { %v2492_v20 = vsub.f32 %v3957_v28, %v2490_v32  ;;  %v2495_v35 = vmul.f32 %v2493_v33, %v2493_v33 }
0x18d3   :  { %v2494_v34 = vmul.f32 %v2492_v20, %v2492_v20  ;;  %v2499_v36 = vsel %vm73_vm0, %v2495_v35, 0.0 }
0x18d5   :  { %v2496_v22 = vsel %vm73_vm0, %v2494_v34, 0.0 }
0x18d6   :  { %2497 = vadd.xlane.f32.xlu0 %v2496_v22 }
0x18da   :  { %2500 = vadd.xlane.f32.xlu0 %v2499_v36 }
0x195f   :  { %v2498_v43 = vpop.xlane.xlu0 %2497 }
0x1960   :  { %v2502_v44 = vmul.f32 0.032258064, %v2498_v43 }
0x1962   :  { %3344 = vrsqrt.f32 %v2502_v44  ;;  %vm2506_vm5 = vcmp.eq.f32.partialorder %v2502_v44, inf  ;;  %v2509_v52 = vand.u32 2147483648, %v2502_v44  ;;  %vm2508_vm6 = vcmp.eq.f32.partialorder %v2502_v44, 0.0 }
0x1963   :  { %v2501_v45 = vpop.xlane.xlu0 %2500 }
0x1964   :  { %v2503_v47 = vmul.f32 0.032258064, %v2501_v45 }
0x1966   :  { %3346 = vrsqrt.f32 %v2503_v47  ;;  %vm2513_vm7 = vcmp.eq.f32.partialorder %v2503_v47, inf  ;;  %v2516_v60 = vand.u32 2147483648, %v2503_v47  ;;  %vm2515_vm8 = vcmp.eq.f32.partialorder %v2503_v47, 0.0 }
0x196f   :  { %v3345_v51 = vpop.eup %3344 }
0x1970   :  { %v2505_v57 = vmul.f32 %v3345_v51, %v2502_v44 }
0x1972   :  { %v2507_v53 = vsel %vm2506_vm5, %v2502_v44, %v2505_v57 }
0x1973   :  { %v3347_v54 = vpop.eup %3346  ;;  %v2510_v58 = vsel %vm2508_vm6, %v2509_v52, %v2507_v53 }
0x1974   :  { %v2518_v55 = vadd.f32 1e-06, %v2510_v58  ;;  %v2512_v56 = vmul.f32 %v3347_v54, %v2503_v47  ;;  %v2899_v58 = vld [vmem:[#allocation8 + $0x10] ss:$0 sm:$0xff] }
0x1976   :  { %3348 = vrcp.f32 %v2518_v55  ;;  %v2514_v8 = vsel %vm2513_vm7, %v2503_v47, %v2512_v56  ;;  %v2900_v56 = vld [vmem:[#allocation8 + $0x11] ss:$0 sm:$0xff] }
0x1977   :  { %v2517_v62 = vsel %vm2515_vm8, %v2516_v60, %v2514_v8 }
0x1978   :  { %v2519_v63 = vadd.f32 1e-06, %v2517_v62 }
0x197a   :  { %3350 = vrcp.f32 %v2519_v63 }
0x1983   :  { %v3349_v46 = vpop.eup %3348 }
0x1984   :  { %v2521_v3 = vmul.f32 %v3349_v46, %v2492_v20 }
0x1986   :  { %v2528_v5 = vmul.f32 %v2879_v2, %v2521_v3 }
0x1987   :  { %v3351_v7 = vpop.eup %3350 }
0x1988   :  { %v2523_v11 = vmul.f32 %v3351_v7, %v2493_v33  ;;  %v2534_v12 = vadd.f32 %v2880_v4, %v2528_v5 }
0x198a   :  { %v2529_v13 = vmul.f32 %v2879_v2, %v2523_v11  ;;  %3215 = vmatprep.mubr.msk.f32.mxu1 %vm73_vm0, %v2534_v12 }
0x198c   :  { %v2535_v14 = vadd.f32 %v2880_v4, %v2529_v13 }
0x198e   :  { %3216 = vmatmul.mubr.msk.f32.vlgmr.msra.gmra.mxu1 %vm73_vm0, %v2535_v14 }
0x1a4e   :  { %v3217_v21 = vpop.f32.mrf.mxu1 }
0x1a4f   :  { %v2623_v23 = vadd.f32 %v3217_v21, %v2885_v19 }
0x1a50   :  { %v2617_v1 = vpop.f32.mrf.mxu1 }
0x1a51   :  { %v2618_v24 = vadd.f32 %v2885_v19, %v2617_v1  ;;  %v2627_v49 = vmax.f32 %v2623_v23, 0.0 }
0x1a53   :  { %v2626_v0 = vmax.f32 %v2618_v24, 0.0 }
0x1a55   :  { %3234 = vmatprep.mubr.msk.f32.mxu0 %vm1317_vm1, %v2626_v0 }
0x1a56   :  { %3235 = vmatmul.mubr.msk.f32.vlgmr.msra.gmra.mxu0 %vm1317_vm1, %v2627_v49 }
0x1b16   :  { %v3236_v26 = vpop.f32.mrf.mxu0 }
0x1b17   :  { %v2720_v15 = vadd.f32 %v3236_v26, %v2896_v25 }
0x1b18   :  { %v2714_v27 = vpop.f32.mrf.mxu0 }
0x1b19   :  { %v2724_v50 = vadd.f32 %v2720_v15, %v3954_v61  ;;  %v2715_v29 = vadd.f32 %v2896_v25, %v2714_v27 }
0x1b1b   :  { %v2723_v59 = vadd.f32 %v2715_v29, %v3957_v28  ;;  %v2730_v30 = vsel %vm73_vm0, %v2724_v50, 0.0 }
0x1b1c   :  { %2731 = vadd.xlane.f32.xlu1 %v2730_v30 }
0x1b1d   :  { %v2727_v10 = vsel %vm73_vm0, %v2723_v59, 0.0 }
0x1b1e   :  { %2728 = vadd.xlane.f32.xlu0 %v2727_v10 }
0x1ba5   :  { %v2732_v31 = vpop.xlane.xlu1 %2731 }
0x1ba6   :  { %v2734_v32 = vmul.f32 0.03125, %v2732_v31 }
0x1ba7   :  { %v2729_v33 = vpop.xlane.xlu0 %2728 }
0x1ba8   :  { %v2736_v20 = vsub.f32 %v2724_v50, %v2734_v32  ;;  %v2733_v34 = vmul.f32 0.03125, %v2729_v33 }
0x1baa   :  { %v2735_v22 = vsub.f32 %v2723_v59, %v2733_v34  ;;  %v2738_v35 = vmul.f32 %v2736_v20, %v2736_v20 }
0x1bac   :  { %v2742_v36 = vsel %vm73_vm0, %v2738_v35, 0.0  ;;  %v2737_v37 = vmul.f32 %v2735_v22, %v2735_v22 }
0x1bad   :  { %2743 = vadd.xlane.f32.xlu1 %v2742_v36 }
0x1bae   :  { %v2739_v61 = vsel %vm73_vm0, %v2737_v37, 0.0 }
0x1baf   :  { %2740 = vadd.xlane.f32.xlu0 %v2739_v61 }
0x1c36   :  { %v2744_v28 = vpop.xlane.xlu1 %2743 }
0x1c37   :  { %v2746_v38 = vmul.f32 0.032258064, %v2744_v28 }
0x1c38   :  { %v2741_v9 = vpop.xlane.xlu0 %2740 }
0x1c39   :  { %3352 = vrsqrt.f32 %v2746_v38  ;;  %v2745_v39 = vmul.f32 0.032258064, %v2741_v9  ;;  %vm2756_vm9 = vcmp.eq.f32.partialorder %v2746_v38, inf  ;;  %v2759_v48 = vand.u32 2147483648, %v2746_v38 }
0x1c3a   :  { %vm2758_vm10 = vcmp.eq.f32.partialorder %v2746_v38, 0.0 }
0x1c3b   :  { %3354 = vrsqrt.f32 %v2745_v39  ;;  %vm2749_vm11 = vcmp.eq.f32.partialorder %v2745_v39, inf  ;;  %v2752_v51 = vand.u32 2147483648, %v2745_v39  ;;  %vm2751_vm13 = vcmp.eq.f32.partialorder %v2745_v39, 0.0 }
0x1c46   :  { %v3353_v40 = vpop.eup %3352 }
0x1c47   :  { %v2755_v41 = vmul.f32 %v3353_v40, %v2746_v38 }
0x1c48   :  { %v3355_v42 = vpop.eup %3354 }
0x1c49   :  { %v2757_v43 = vsel %vm2756_vm9, %v2746_v38, %v2755_v41  ;;  %v2748_v45 = vmul.f32 %v3355_v42, %v2745_v39 }
0x1c4a   :  { %v2760_v44 = vsel %vm2758_vm10, %v2759_v48, %v2757_v43 }
0x1c4b   :  { %v2762_v47 = vadd.f32 1e-06, %v2760_v44  ;;  %v2750_v57 = vsel %vm2749_vm11, %v2745_v39, %v2748_v45 }
0x1c4c   :  { %v2753_v52 = vsel %vm2751_vm13, %v2752_v51, %v2750_v57 }
0x1c4d   :  { %3356 = vrcp.f32 %v2762_v47  ;;  %v2761_v53 = vadd.f32 1e-06, %v2753_v52 }
0x1c4f   :  { %3358 = vrcp.f32 %v2761_v53 }
0x1c5a   :  { %v3357_v54 = vpop.eup %3356 }
0x1c5b   :  { %v2766_v55 = vmul.f32 %v3357_v54, %v2736_v20 }
0x1c5c   :  { %v3359_v60 = vpop.eup %3358 }
0x1c5d   :  { %v2772_v8 = vmul.f32 %v2899_v58, %v2766_v55  ;;  %v2764_v62 = vmul.f32 %v3359_v60, %v2735_v22 }
0x1c5f   :  { %v2778_v63 = vadd.f32 %v2900_v56, %v2772_v8  ;;  %v2771_v46 = vmul.f32 %v2899_v58, %v2764_v62 }
0x1c61   :  { %2780 = vst.msk [vmem:[#allocation9 + $0x8] sm:$0xff] %vm73_vm0, %v2778_v63  ;;  %v2777_v2 = vadd.f32 %v2900_v56, %v2771_v46 }
0x1c63   :  { %2779 = vst.msk [vmem:[#allocation9] sm:$0xff] %vm73_vm0, %v2777_v2 }
0x1c64   :  { %3433 = shalt.err (!%p3430_p5)
}
0x1c65   :  { %2792 = dma.vmem_to_hbm [thread:$0]  %s2787_s20, 256, %s4026_s5, [#allocation5], %s3450_s23, %s3450_s23, %s3451_s24  }
0x1c66   :  { %3446 = dma.done.wait [#allocation5], 256  }
0x1c67   :  { %3447 = vsyncadd [#allocation5], 4294967040 }
0x1c68   :  { %2796 = vsyncpa [#allocation4], 1 }
0x1c69   :  { %2797 = vsyncpa [#allocation7], 1 }
0x1c6a   :  { %2798 = vsyncpa [#allocation5], 1 }

</bundles_post_ra>
